<compile_context>
chip_gen: v7x
topology: tpu7x:2x2x1
jax: 0.10.0
libtpu: 0.0.40
codegen_flags: <defaults>
</compile_context>

<pallas_src>
import jax
import jax.numpy as jnp
from jax import lax
from jax.experimental import pallas as pl
from jax.experimental.pallas import tpu as pltpu

LANE = 128      # vreg lane width  -> lane-dense feature / node padding target
SUBLANE = 8     # vreg sublane height -> graph-count padding target (head matmul M)


def _round_up(x, m):
    return ((x + m - 1) // m) * m


def _pad_to(x, shape):
    """Zero-pad an array up to `shape` (trailing padding on every axis)."""
    pads = [(0, s - d) for s, d in zip(shape, x.shape)]
    if all(p == (0, 0) for p in pads):
        return x
    return jnp.pad(x, pads)


# ---------------- kernel 1: per-graph GCN stack + mean pool (grid over graphs) ----------------

def make_gcn_pool_kernel(depth, n_real, n_pad):
    """One grid step = one graph: depth x SiLU(A_hat @ H @ W_i + b_i), then mean
    over the n_real real nodes. A_hat / H / W are bf16 MXU operands; accumulation,
    bias-add, SiLU and the pool are f32."""

    def kernel(a_ref, h_ref, w_ref, b_ref, pooled_ref):
        a = a_ref[0]                                   # (n_pad, n_pad)  bf16
        h = h_ref[0]                                   # (n_pad, f_pad)  bf16
        h_f32 = None
        for i in range(depth):                         # small, fixed depth -> unrolled
            w = w_ref[i]                               # (f_pad, f_pad)  bf16
            b = b_ref[i]                               # (1, f_pad)      f32
            ah = jnp.dot(a, h, preferred_element_type=jnp.float32)          # message passing
            z = jnp.dot(ah.astype(jnp.bfloat16), w,
                        preferred_element_type=jnp.float32) + b             # GraphConv linear
            h_f32 = z * jax.nn.sigmoid(z)                                    # SiLU (f32)
            h = h_f32.astype(jnp.bfloat16)                                   # bf16 for next MXU pass

        # dgl.mean_nodes: mean over the REAL node rows only.  Padded node rows are
        # SiLU(b) != 0, so mask them out — but only when padding actually added rows.
        if n_pad != n_real:
            row = lax.broadcasted_iota(jnp.int32, h_f32.shape, 0)
            h_f32 = jnp.where(row < n_real, h_f32, 0.0)
        pooled_ref[0] = jnp.sum(h_f32, axis=0, keepdims=True) * (1.0 / float(n_real))

    return kernel


# ---------------- kernel 2: Aggregation head, once over the whole (G, hid) slab ----------------

def head_kernel(p_ref, w0_ref, b0_ref, w1_ref, b1_ref, o_ref):
    p = p_ref[...]                                                   # (g_pad, f_pad) f32
    z0 = jnp.tanh(jnp.dot(p.astype(jnp.bfloat16), w0_ref[...],
                          preferred_element_type=jnp.float32) + b0_ref[...])
    out = jnp.dot(z0.astype(jnp.bfloat16), w1_ref[...],
                  preferred_element_type=jnp.float32) + b1_ref[...]
    o_ref[...] = out.astype(o_ref.dtype)


# ---------------- wrapper ----------------

def gnn_forward_impl(a_hat, h, params):
    """a_hat: (G, N, N) normalized dense adjacency, h: (G, N, IN_F) node features."""
    depth = len(params["layers"])
    G, n, _ = a_hat.shape
    in_f = h.shape[-1]
    hid = params["layers"][0][0].shape[1]
    out_f = params["W1"].shape[1]

    n_pad = _round_up(n, LANE)                       # lane-dense node axis, M=128 MXU rows
    f_pad = _round_up(max(in_f, hid), LANE)          # one common feature pad -> stackable weights
    out_pad = _round_up(out_f, LANE)
    g_pad = _round_up(G, SUBLANE)

    # Zero padding keeps results exact: padded A rows/cols are 0, padded W/b entries
    # are 0 (padded feature columns stay exactly 0 through SiLU/tanh), and the pool
    # masks padded node rows and divides by n_real.
    a_p = _pad_to(a_hat, (G, n_pad, n_pad)).astype(jnp.bfloat16)
    h_p = _pad_to(h, (G, n_pad, f_pad)).astype(jnp.bfloat16)
    w_stack = jnp.stack(
        [_pad_to(w, (f_pad, f_pad)) for (w, _) in params["layers"]]).astype(jnp.bfloat16)
    b_stack = jnp.stack(
        [_pad_to(b.reshape(1, -1), (1, f_pad)) for (_, b) in params["layers"]])   # f32

    # Advisory cost estimate on REAL (unpadded) dims.
    flops = 0
    f_prev = in_f
    for _ in range(depth):
        flops += G * (2 * n * n * f_prev + 2 * n * f_prev * hid)
        f_prev = hid
    trans = G * depth * n * hid
    bytes_acc = (int(a_hat.size) + int(h.size)) * 4 \
        + sum(int(w.size) * 4 + int(b.size) * 4 for (w, b) in params["layers"]) \
        + G * hid * 4

    pooled = pl.pallas_call(
        make_gcn_pool_kernel(depth, n, n_pad),
        out_shape=jax.ShapeDtypeStruct((G, 1, f_pad), jnp.float32),
        grid=(G,),
        in_specs=[
            pl.BlockSpec((1, n_pad, n_pad), lambda g: (g, 0, 0)),        # A_hat of graph g
            pl.BlockSpec((1, n_pad, f_pad), lambda g: (g, 0, 0)),        # H of graph g
            pl.BlockSpec((depth, f_pad, f_pad), lambda g: (0, 0, 0)),    # stacked W (resident)
            pl.BlockSpec((depth, 1, f_pad), lambda g: (0, 0, 0)),        # stacked b (resident)
        ],
        out_specs=pl.BlockSpec((1, 1, f_pad), lambda g: (g, 0, 0)),
        compiler_params=pltpu.CompilerParams(
            dimension_semantics=("parallel",),       # v7x: shard graphs across both TCs
            vmem_limit_bytes=64 * 1024 * 1024,
        ),
        cost_estimate=pl.CostEstimate(flops=flops, transcendentals=trans,
                                      bytes_accessed=bytes_acc),
    )(a_p, h_p, w_stack, b_stack)

    pooled = _pad_to(pooled.reshape(G, f_pad), (g_pad, f_pad))

    w0 = _pad_to(params["W0"], (f_pad, f_pad)).astype(jnp.bfloat16)
    b0 = _pad_to(params["B0"].reshape(1, -1), (1, f_pad))
    w1 = _pad_to(params["W1"], (f_pad, out_pad)).astype(jnp.bfloat16)
    b1 = _pad_to(params["B1"].reshape(1, -1), (1, out_pad))

    head_flops = G * (2 * hid * hid + 2 * hid * out_f)
    head_bytes = (g_pad * f_pad + out_f) * 4 + (hid * hid + hid * out_f) * 2 + (hid + out_f) * 4
    out = pl.pallas_call(
        head_kernel,
        out_shape=jax.ShapeDtypeStruct((g_pad, out_pad), jnp.float32),
        in_specs=[
            pl.BlockSpec((g_pad, f_pad), lambda: (0, 0)),
            pl.BlockSpec((f_pad, f_pad), lambda: (0, 0)),
            pl.BlockSpec((1, f_pad), lambda: (0, 0)),
            pl.BlockSpec((f_pad, out_pad), lambda: (0, 0)),
            pl.BlockSpec((1, out_pad), lambda: (0, 0)),
        ],
        out_specs=pl.BlockSpec((g_pad, out_pad), lambda: (0, 0)),
        compiler_params=pltpu.CompilerParams(vmem_limit_bytes=32 * 1024 * 1024),
        cost_estimate=pl.CostEstimate(flops=head_flops, transcendentals=G * hid,
                                      bytes_accessed=head_bytes),
    )(pooled, w0, b0, w1, b1)

    return out[:G, :out_f]


gnn_forward = jax.jit(gnn_forward_impl)


# ---------------- pure-JAX reference (sanity check) ----------------

def ref_forward(a_hat, h, params):
    for (w, b) in params["layers"]:
        z = jnp.einsum('gnm,gmf->gnf', a_hat, h) @ w + b
        h = z * jax.nn.sigmoid(z)
    hm = h.mean(axis=1)                                          # dgl.mean_nodes per graph
    z0 = jnp.tanh(hm @ params["W0"] + params["B0"])
    return z0 @ params["W1"] + params["B1"]


# ---------------- setup ----------------

def build_graph(key, n_nodes):
    # random undirected simple graph -> dense symmetric-normalized adjacency
    a = (jax.random.uniform(key, (n_nodes, n_nodes)) > 0.5).astype(jnp.float32)
    a = jnp.maximum(a, a.T)
    a = a * (1.0 - jnp.eye(n_nodes, dtype=jnp.float32))          # no self loops
    deg = jnp.maximum(a.sum(axis=1), 1.0)                        # DGL clamps degree >= 1
    d_inv_sqrt = 1.0 / jnp.sqrt(deg)
    return a * d_inv_sqrt[:, None] * d_inv_sqrt[None, :]


def init_params(key, in_features, hidden_features, out_features, depth):
    keys = jax.random.split(key, depth + 4)
    layers = []
    for idx in range(depth):
        f_in = in_features if idx == 0 else hidden_features
        w = 0.1 * jax.random.normal(keys[idx], (f_in, hidden_features), jnp.float32)
        b = jnp.zeros((hidden_features,), jnp.float32)           # GraphConv bias init = zeros
        layers.append((w, b))
    # Aggregation: 0.01 * randn, matching the module __init__
    w0 = 0.01 * jax.random.normal(keys[depth + 0], (hidden_features, hidden_features), jnp.float32)
    b0 = 0.01 * jax.random.normal(keys[depth + 1], (hidden_features,), jnp.float32)
    w1 = 0.01 * jax.random.normal(keys[depth + 2], (hidden_features, out_features), jnp.float32)
    b1 = 0.01 * jax.random.normal(keys[depth + 3], (out_features,), jnp.float32)
    return {"layers": layers, "W0": w0, "B0": b0, "W1": w1, "B1": b1}


if __name__ == "__main__":
    G = 8                       # batched graphs (== dgl.batch of G graphs)
    N_NODES = 32                # nodes per graph
    IN_F, HID_F, OUT_F, DEPTH = 16, 32, 8, 3

    key = jax.random.PRNGKey(0)
    k_graph, k_feat, k_param = jax.random.split(key, 3)
    graph_keys = jax.random.split(k_graph, G)

    a_hat = jax.vmap(lambda k: build_graph(k, N_NODES))(graph_keys)   # (G, N, N)
    h0 = jax.random.normal(k_feat, (G, N_NODES, IN_F), jnp.float32)   # (G, N, IN_F)
    params = init_params(k_param, IN_F, HID_F, OUT_F, DEPTH)

    out = gnn_forward(a_hat, h0, params)
    out = jax.block_until_ready(out)

    ref = ref_forward(a_hat, h0, params)
    assert out.shape == (G, OUT_F)
    assert bool(jnp.all(jnp.isfinite(out)))
    assert jnp.allclose(out, ref, rtol=2e-2, atol=1e-3), float(jnp.max(jnp.abs(out - ref)))

    print("KERNEL_OK")
</pallas_src>

<mosaic_0001>
module attributes {stable_mosaic.version = 11 : i64} {
  func.func @kernel(%arg0: i32, %arg1: memref<1x128x128xbf16, #tpu.memory_space<vmem>>, %arg2: memref<1x128x128xbf16, #tpu.memory_space<vmem>>, %arg3: memref<3x128x128xbf16, #tpu.memory_space<vmem>>, %arg4: memref<3x1x128xf32, #tpu.memory_space<vmem>>, %arg5: memref<1x1x128xf32, #tpu.memory_space<vmem>>) attributes {dimension_semantics = [#tpu.dimension_semantics<parallel>], iteration_bounds = array<i64: 8>, scalar_prefetch = 0 : i64, scratch_operands = 0 : i64, tpu.core_type = #tpu.core_type<tc>, window_params = [{transform_indices = @transform_0, window_bounds = array<i64: 1, 128, 128>}, {transform_indices = @transform_1, window_bounds = array<i64: 1, 128, 128>}, {pipeline_mode = #tpu.pipeline_mode<synchronous>, transform_indices = @transform_2, window_bounds = array<i64: 3, 128, 128>}, {pipeline_mode = #tpu.pipeline_mode<synchronous>, transform_indices = @transform_3, window_bounds = array<i64: 3, 1, 128>}, {transform_indices = @transform_4, window_bounds = array<i64: 1, 1, 128>}]} {
    %c0 = arith.constant 0 : index
    %c0_0 = arith.constant 0 : index
    %c0_1 = arith.constant 0 : index
    %0 = vector.load %arg1[%c0, %c0_0, %c0_1] : memref<1x128x128xbf16, #tpu.memory_space<vmem>>, vector<1x128x128xbf16>
    %1 = vector.shape_cast %0 : vector<1x128x128xbf16> to vector<128x128xbf16>
    %c0_2 = arith.constant 0 : index
    %c0_3 = arith.constant 0 : index
    %c0_4 = arith.constant 0 : index
    %2 = vector.load %arg2[%c0_2, %c0_3, %c0_4] : memref<1x128x128xbf16, #tpu.memory_space<vmem>>, vector<1x128x128xbf16>
    %3 = vector.shape_cast %2 : vector<1x128x128xbf16> to vector<128x128xbf16>
    %c0_5 = arith.constant 0 : index
    %c0_6 = arith.constant 0 : index
    %c0_7 = arith.constant 0 : index
    %4 = vector.load %arg3[%c0_5, %c0_6, %c0_7] : memref<3x128x128xbf16, #tpu.memory_space<vmem>>, vector<1x128x128xbf16>
    %5 = vector.shape_cast %4 : vector<1x128x128xbf16> to vector<128x128xbf16>
    %c0_8 = arith.constant 0 : index
    %c0_9 = arith.constant 0 : index
    %c0_10 = arith.constant 0 : index
    %6 = vector.load %arg4[%c0_8, %c0_9, %c0_10] : memref<3x1x128xf32, #tpu.memory_space<vmem>>, vector<1x1x128xf32>
    %7 = vector.shape_cast %6 : vector<1x1x128xf32> to vector<1x128xf32>
    %cst = arith.constant dense<0.000000e+00> : vector<128x128xf32>
    %8 = tpu.matmul %1, %3, %cst {dimension_numbers = #tpu.dot_dimension_numbers<[1], [0], [0], [1], [0, 0, 1, 1], [], []>} : vector<128x128xbf16>, vector<128x128xbf16>, vector<128x128xf32> -> vector<128x128xf32>
    %9 = arith.truncf %8 : vector<128x128xf32> to vector<128x128xbf16>
    %cst_11 = arith.constant dense<0.000000e+00> : vector<128x128xf32>
    %10 = tpu.matmul %9, %5, %cst_11 {dimension_numbers = #tpu.dot_dimension_numbers<[1], [0], [0], [1], [0, 0, 1, 1], [], []>} : vector<128x128xbf16>, vector<128x128xbf16>, vector<128x128xf32> -> vector<128x128xf32>
    %11 = vector.broadcast %7 : vector<1x128xf32> to vector<128x128xf32>
    %12 = arith.addf %10, %11 : vector<128x128xf32>
    %13 = arith.negf %12 : vector<128x128xf32>
    %14 = math.exp %13 : vector<128x128xf32>
    %cst_12 = arith.constant 1.000000e+00 : f32
    %15 = vector.broadcast %cst_12 : f32 to vector<128x128xf32>
    %16 = arith.addf %15, %14 : vector<128x128xf32>
    %17 = arith.divf %15, %16 : vector<128x128xf32>
    %18 = arith.mulf %12, %17 : vector<128x128xf32>
    %19 = arith.truncf %18 : vector<128x128xf32> to vector<128x128xbf16>
    %c1 = arith.constant 1 : index
    %c0_13 = arith.constant 0 : index
    %c0_14 = arith.constant 0 : index
    %20 = vector.load %arg3[%c1, %c0_13, %c0_14] : memref<3x128x128xbf16, #tpu.memory_space<vmem>>, vector<1x128x128xbf16>
    %21 = vector.shape_cast %20 : vector<1x128x128xbf16> to vector<128x128xbf16>
    %c1_15 = arith.constant 1 : index
    %c0_16 = arith.constant 0 : index
    %c0_17 = arith.constant 0 : index
    %22 = vector.load %arg4[%c1_15, %c0_16, %c0_17] : memref<3x1x128xf32, #tpu.memory_space<vmem>>, vector<1x1x128xf32>
    %23 = vector.shape_cast %22 : vector<1x1x128xf32> to vector<1x128xf32>
    %cst_18 = arith.constant dense<0.000000e+00> : vector<128x128xf32>
    %24 = tpu.matmul %1, %19, %cst_18 {dimension_numbers = #tpu.dot_dimension_numbers<[1], [0], [0], [1], [0, 0, 1, 1], [], []>} : vector<128x128xbf16>, vector<128x128xbf16>, vector<128x128xf32> -> vector<128x128xf32>
    %25 = arith.truncf %24 : vector<128x128xf32> to vector<128x128xbf16>
    %cst_19 = arith.constant dense<0.000000e+00> : vector<128x128xf32>
    %26 = tpu.matmul %25, %21, %cst_19 {dimension_numbers = #tpu.dot_dimension_numbers<[1], [0], [0], [1], [0, 0, 1, 1], [], []>} : vector<128x128xbf16>, vector<128x128xbf16>, vector<128x128xf32> -> vector<128x128xf32>
    %27 = vector.broadcast %23 : vector<1x128xf32> to vector<128x128xf32>
    %28 = arith.addf %26, %27 : vector<128x128xf32>
    %29 = arith.negf %28 : vector<128x128xf32>
    %30 = math.exp %29 : vector<128x128xf32>
    %cst_20 = arith.constant 1.000000e+00 : f32
    %31 = vector.broadcast %cst_20 : f32 to vector<128x128xf32>
    %32 = arith.addf %31, %30 : vector<128x128xf32>
    %33 = arith.divf %31, %32 : vector<128x128xf32>
    %34 = arith.mulf %28, %33 : vector<128x128xf32>
    %35 = arith.truncf %34 : vector<128x128xf32> to vector<128x128xbf16>
    %c2 = arith.constant 2 : index
    %c0_21 = arith.constant 0 : index
    %c0_22 = arith.constant 0 : index
    %36 = vector.load %arg3[%c2, %c0_21, %c0_22] : memref<3x128x128xbf16, #tpu.memory_space<vmem>>, vector<1x128x128xbf16>
    %37 = vector.shape_cast %36 : vector<1x128x128xbf16> to vector<128x128xbf16>
    %c2_23 = arith.constant 2 : index
    %c0_24 = arith.constant 0 : index
    %c0_25 = arith.constant 0 : index
    %38 = vector.load %arg4[%c2_23, %c0_24, %c0_25] : memref<3x1x128xf32, #tpu.memory_space<vmem>>, vector<1x1x128xf32>
    %39 = vector.shape_cast %38 : vector<1x1x128xf32> to vector<1x128xf32>
    %cst_26 = arith.constant dense<0.000000e+00> : vector<128x128xf32>
    %40 = tpu.matmul %1, %35, %cst_26 {dimension_numbers = #tpu.dot_dimension_numbers<[1], [0], [0], [1], [0, 0, 1, 1], [], []>} : vector<128x128xbf16>, vector<128x128xbf16>, vector<128x128xf32> -> vector<128x128xf32>
    %41 = arith.truncf %40 : vector<128x128xf32> to vector<128x128xbf16>
    %cst_27 = arith.constant dense<0.000000e+00> : vector<128x128xf32>
    %42 = tpu.matmul %41, %37, %cst_27 {dimension_numbers = #tpu.dot_dimension_numbers<[1], [0], [0], [1], [0, 0, 1, 1], [], []>} : vector<128x128xbf16>, vector<128x128xbf16>, vector<128x128xf32> -> vector<128x128xf32>
    %43 = vector.broadcast %39 : vector<1x128xf32> to vector<128x128xf32>
    %44 = arith.addf %42, %43 : vector<128x128xf32>
    %45 = arith.negf %44 : vector<128x128xf32>
    %46 = math.exp %45 : vector<128x128xf32>
    %cst_28 = arith.constant 1.000000e+00 : f32
    %47 = vector.broadcast %cst_28 : f32 to vector<128x128xf32>
    %48 = arith.addf %47, %46 : vector<128x128xf32>
    %49 = arith.divf %47, %48 : vector<128x128xf32>
    %50 = arith.mulf %44, %49 : vector<128x128xf32>
    %51 = tpu.iota {dimensions = array<i32: 0>} : vector<128x128xi32>
    %c32_i32 = arith.constant 32 : i32
    %52 = vector.broadcast %c32_i32 : i32 to vector<128x128xi32>
    %53 = arith.cmpi slt, %51, %52 : vector<128x128xi32>
    %cst_29 = arith.constant 0.000000e+00 : f32
    %54 = vector.broadcast %cst_29 : f32 to vector<128x128xf32>
    %55 = arith.select %53, %50, %54 : vector<128x128xi1>, vector<128x128xf32>
    %cst_30 = arith.constant dense<0.000000e+00> : vector<128xf32>
    %56 = vector.multi_reduction <add>, %55, %cst_30 [0] : vector<128x128xf32> to vector<128xf32>
    %57 = vector.shape_cast %56 : vector<128xf32> to vector<1x128xf32>
    %cst_31 = arith.constant 3.125000e-02 : f32
    %58 = vector.broadcast %cst_31 : f32 to vector<1x128xf32>
    %59 = arith.mulf %57, %58 : vector<1x128xf32>
    %c0_32 = arith.constant 0 : index
    %c0_33 = arith.constant 0 : index
    %c0_34 = arith.constant 0 : index
    %60 = vector.load %arg5[%c0_32, %c0_33, %c0_34] : memref<1x1x128xf32, #tpu.memory_space<vmem>>, vector<1x1x128xf32>
    %61 = vector.shape_cast %60 : vector<1x1x128xf32> to vector<1x128xf32>
    %62 = vector.shape_cast %59 : vector<1x128xf32> to vector<1x1x128xf32>
    tpu.vector_store %arg5[%c0_32, %c0_33, %c0_34], %62 {strides = array<i32>} : memref<1x1x128xf32, #tpu.memory_space<vmem>>, vector<1x1x128xf32>,
    return
  }
  func.func @transform_0(%arg0: i32) -> (i32, i32, i32) {
    %c0_i32 = arith.constant 0 : i32
    %c0_i32_0 = arith.constant 0 : i32
    %c0_i32_1 = arith.constant 0 : i32
    return %arg0, %c0_i32, %c0_i32_0 : i32, i32, i32
  }
  func.func @transform_1(%arg0: i32) -> (i32, i32, i32) {
    %c0_i32 = arith.constant 0 : i32
    %c0_i32_0 = arith.constant 0 : i32
    %c0_i32_1 = arith.constant 0 : i32
    return %arg0, %c0_i32, %c0_i32_0 : i32, i32, i32
  }
  func.func @transform_2(%arg0: i32) -> (i32, i32, i32) {
    %c0_i32 = arith.constant 0 : i32
    %c0_i32_0 = arith.constant 0 : i32
    %c0_i32_1 = arith.constant 0 : i32
    %c0_i32_2 = arith.constant 0 : i32
    return %c0_i32, %c0_i32_0, %c0_i32_1 : i32, i32, i32
  }
  func.func @transform_3(%arg0: i32) -> (i32, i32, i32) {
    %c0_i32 = arith.constant 0 : i32
    %c0_i32_0 = arith.constant 0 : i32
    %c0_i32_1 = arith.constant 0 : i32
    %c0_i32_2 = arith.constant 0 : i32
    return %c0_i32, %c0_i32_0, %c0_i32_1 : i32, i32, i32
  }
  func.func @transform_4(%arg0: i32) -> (i32, i32, i32) {
    %c0_i32 = arith.constant 0 : i32
    %c0_i32_0 = arith.constant 0 : i32
    %c0_i32_1 = arith.constant 0 : i32
    return %arg0, %c0_i32, %c0_i32_0 : i32, i32, i32
  }
}

module attributes {stable_mosaic.version = 11 : i64} {
  func.func @head_kernel(%arg0: memref<8x128xf32, #tpu.memory_space<vmem>>, %arg1: memref<128x128xbf16, #tpu.memory_space<vmem>>, %arg2: memref<1x128xf32, #tpu.memory_space<vmem>>, %arg3: memref<128x128xbf16, #tpu.memory_space<vmem>>, %arg4: memref<1x128xf32, #tpu.memory_space<vmem>>, %arg5: memref<8x128xf32, #tpu.memory_space<vmem>>) attributes {dimension_semantics = [], scalar_prefetch = 0 : i64, scratch_operands = 0 : i64, tpu.core_type = #tpu.core_type<tc>} {
    %c0 = arith.constant 0 : index
    %c0_0 = arith.constant 0 : index
    %0 = vector.load %arg0[%c0, %c0_0] : memref<8x128xf32, #tpu.memory_space<vmem>>, vector<8x128xf32>
    %1 = arith.truncf %0 : vector<8x128xf32> to vector<8x128xbf16>
    %c0_1 = arith.constant 0 : index
    %c0_2 = arith.constant 0 : index
    %2 = vector.load %arg1[%c0_1, %c0_2] : memref<128x128xbf16, #tpu.memory_space<vmem>>, vector<128x128xbf16>
    %cst = arith.constant dense<0.000000e+00> : vector<8x128xf32>
    %3 = tpu.matmul %1, %2, %cst {dimension_numbers = #tpu.dot_dimension_numbers<[1], [0], [0], [1], [0, 0, 1, 1], [], []>} : vector<8x128xbf16>, vector<128x128xbf16>, vector<8x128xf32> -> vector<8x128xf32>
    %c0_3 = arith.constant 0 : index
    %c0_4 = arith.constant 0 : index
    %4 = vector.load %arg2[%c0_3, %c0_4] : memref<1x128xf32, #tpu.memory_space<vmem>>, vector<1x128xf32>
    %5 = vector.broadcast %4 : vector<1x128xf32> to vector<8x128xf32>
    %6 = arith.addf %3, %5 : vector<8x128xf32>
    %7 = math.tanh %6 : vector<8x128xf32>
    %8 = arith.truncf %7 : vector<8x128xf32> to vector<8x128xbf16>
    %c0_5 = arith.constant 0 : index
    %c0_6 = arith.constant 0 : index
    %9 = vector.load %arg3[%c0_5, %c0_6] : memref<128x128xbf16, #tpu.memory_space<vmem>>, vector<128x128xbf16>
    %cst_7 = arith.constant dense<0.000000e+00> : vector<8x128xf32>
    %10 = tpu.matmul %8, %9, %cst_7 {dimension_numbers = #tpu.dot_dimension_numbers<[1], [0], [0], [1], [0, 0, 1, 1], [], []>} : vector<8x128xbf16>, vector<128x128xbf16>, vector<8x128xf32> -> vector<8x128xf32>
    %c0_8 = arith.constant 0 : index
    %c0_9 = arith.constant 0 : index
    %11 = vector.load %arg4[%c0_8, %c0_9] : memref<1x128xf32, #tpu.memory_space<vmem>>, vector<1x128xf32>
    %12 = vector.broadcast %11 : vector<1x128xf32> to vector<8x128xf32>
    %13 = arith.addf %10, %12 : vector<8x128xf32>
    %c0_10 = arith.constant 0 : index
    %c0_11 = arith.constant 0 : index
    %14 = vector.load %arg5[%c0_10, %c0_11] : memref<8x128xf32, #tpu.memory_space<vmem>>, vector<8x128xf32>
    tpu.vector_store %arg5[%c0_10, %c0_11], %13 {strides = array<i32>} : memref<8x128xf32, #tpu.memory_space<vmem>>, vector<8x128xf32>,
    return
  }
}

</mosaic_0001>

<bundles_post_ra>
// kernel: gnn_forward_impl.3
= control target key start
LH: loop header
LB: loop body
LE: loop exit
PB: predicated region body
PF: predicated region fallthrough
CT: control target
= control target key end

     0   :  { %v384_v1 = vmov 0.0   ;;  %vm385_vm0 = vmmov 0   ;;  %s486_s0 = inlined_call_operand.vmem [shape: f32[8,128], index: 0, kind: input, shape index: {}]   ;;  %s487_s1 = inlined_call_operand.vmem [shape: bf16[128,128], index: 1, kind: input, shape index: {}]   ;;  %s488_s2 = inlined_call_operand.vmem [shape: f32[1,128], index: 2, kind: input, shape index: {}]   ;;  %s489_s3 = inlined_call_operand.vmem [shape: bf16[128,128], index: 3, kind: input, shape index: {}]   ;;  %s490_s4 = inlined_call_operand.vmem [shape: f32[1,128], index: 4, kind: input, shape index: {}]   ;;  %s491_s5 = inlined_call_operand.hbm [shape: f32[8,128], index: 5, kind: output, shape index: {}]  }
   0x1   :  { %v342_v0 = vld [vmem:[%s487_s1] sm:$0xff]   ;;  %299 = vmatprep.subr.bf16.mxu0 %v384_v1  ;;  %319 = vmatprep.subr.bf16.mxu1 %v384_v1  ;;  %v343_v2 = vld [vmem:[%s487_s1 + $0x8] sm:$0xff]   ;;  %v344_v3 = vld [vmem:[%s487_s1 + $0x10] sm:$0xff]  }
   0x2   :  { %300 = vmatpush3.bf16.msra.mxu0 %v342_v0  ;;  %315 = vmatprep.mubr.msk.bf16.mxu0 %vm385_vm0, %v384_v1  ;;  %v350_v4 = vld [vmem:[%s489_s3] sm:$0xff]   ;;  %v345_v5 = vld [vmem:[%s487_s1 + $0x18] sm:$0xff]   ;;  %v351_v6 = vld [vmem:[%s489_s3 + $0x8] sm:$0xff]  }
   0x3   :  { %301 = vmatprep.subr.bf16.mxu0 %v384_v1  ;;  %335 = vmatprep.mubr.msk.bf16.mxu1 %vm385_vm0, %v384_v1  ;;  %v346_v7 = vld [vmem:[%s487_s1 + $0x20] sm:$0xff]   ;;  %v352_v8 = vld [vmem:[%s489_s3 + $0x10] sm:$0xff]  }
   0x4   :  { %320 = vmatpush3.bf16.msra.mxu1 %v350_v4 }
   0x5   :  { %321 = vmatprep.subr.bf16.mxu1 %v384_v1 }
   0x6   :  { %302 = vmatpush3.bf16.msra.mxu0 %v343_v2 }
   0x7   :  { %303 = vmatprep.subr.bf16.mxu0 %v384_v1 }
   0x8   :  { %322 = vmatpush3.bf16.msra.mxu1 %v351_v6 }
   0xa   :  { %304 = vmatpush3.bf16.msra.mxu0 %v344_v3 }
   0xb   :  { %305 = vmatprep.subr.bf16.mxu0 %v384_v1 }
   0xe   :  { %306 = vmatpush3.bf16.msra.mxu0 %v345_v5 }
   0xf   :  { %307 = vmatprep.subr.bf16.mxu0 %v384_v1 }
  0x10   :  { %10 = vsyncpa [#allocation3], 0  ;;  %323 = vmatprep.subr.bf16.mxu1 %v384_v1  ;;  %v347_v9 = vld [vmem:[%s487_s1 + $0x28] sm:$0xff]   ;;  %v353_v10 = vld [vmem:[%s489_s3 + $0x18] sm:$0xff]   ;;  %s386_s29 = smov [#allocation2]  }
  0x11   :  { %324 = vmatpush3.bf16.msra.mxu1 %v352_v8  ;;  %v348_v11 = vld [vmem:[%s487_s1 + $0x30] sm:$0xff]   ;;  %v349_v12 = vld [vmem:[%s487_s1 + $0x38] sm:$0xff]   ;;  %v22_v13 = vld [vmem:[%s486_s0] sm:$0xff] }
  0x12   :  { %308 = vmatpush3.bf16.msra.mxu0 %v346_v7  ;;  %325 = vmatprep.subr.bf16.mxu1 %v384_v1  ;;  %v23_v14 = vpack.c.bf16 %v22_v13, %v22_v13  ;;  %v354_v15 = vld [vmem:[%s489_s3 + $0x20] sm:$0xff]   ;;  %v355_v16 = vld [vmem:[%s489_s3 + $0x28] sm:$0xff]   ;;  %v356_v17 = vld [vmem:[%s489_s3 + $0x30] sm:$0xff]  }
  0x13   :  { %309 = vmatprep.subr.bf16.mxu0 %v384_v1  ;;  %v357_v18 = vld [vmem:[%s489_s3 + $0x38] sm:$0xff]   ;;  %v263_v19 = vld [vmem:[%s488_s2] ss:$0 sm:$0xff]  ;;  %s255_s3 = sshll.u32 %s386_s29, 4  ;;  %s256_s3 = int_to_ptr.vmem [resolvable:$true] %s255_s3 }
  0x14   :  { %v272_v27 = vld [vmem:[%s490_s4] ss:$0 sm:$0xff]  ;;  %s360_s2 = scalar_lea.vmem %s256_s3, 128  ;;  %p365_p1 = scmp.lt.s32.totalorder %s256_s3, %s256_s3 }
  0x15   :  { %326 = vmatpush3.bf16.msra.mxu1 %v353_v10  ;;  %p361_p0 = scmp.ne.s32.totalorder %s256_s3, %s360_s2  ;;  %p366_p2 = scmp.lt.s32.totalorder %s360_s2, %s360_s2 }
  0x16   :  { %310 = vmatpush3.bf16.msra.mxu0 %v347_v9  ;;  %327 = vmatprep.subr.bf16.mxu1 %v384_v1 }
  0x17   :  { %311 = vmatprep.subr.bf16.mxu0 %v384_v1  ;;  %p367_p3 = por %p366_p2, %p365_p1 }
  0x19   :  { %328 = vmatpush3.bf16.msra.mxu1 %v354_v15  ;;  %p368_p4 = pnand %p367_p3, %p361_p0 }
  0x1a   :  { %312 = vmatpush3.bf16.msra.mxu0 %v348_v11  ;;  %329 = vmatprep.subr.bf16.mxu1 %v384_v1 }
  0x1b   :  { %313 = vmatprep.subr.bf16.mxu0 %v384_v1 }
  0x1d   :  { %330 = vmatpush3.bf16.msra.mxu1 %v355_v16 }
  0x1e   :  { %314 = vmatpush3.bf16.msra.mxu0 %v349_v12  ;;  %331 = vmatprep.subr.bf16.mxu1 %v384_v1 }
  0x21   :  { %316 = vmatmul.mubr.bf16.vlgmr.msra.gmra.mrb[0].mxu0 %v23_v14  ;;  %332 = vmatpush3.bf16.msra.mxu1 %v356_v17 }
  0x22   :  { %333 = vmatprep.subr.bf16.mxu1 %v384_v1 }
  0x25   :  { %334 = vmatpush3.bf16.msra.mxu1 %v357_v18 }
  0xf4   :  { %v129_v20 = vpop.f32.mrb[0].mxu0 }
  0xf5   :  { %v130_v21 = vadd.f32 %v263_v19, %v129_v20  ;;  %v317_v22 = vpop.f32.mrb[1].mxu0 }
  0xf6   :  { %v132_v23 = vpop.f32.mrb[2].mxu0 }
  0xf7   :  { %358 = vtanh.f32 %v130_v21  ;;  %v318_v24 = vpop.f32.mrb[3].mxu0 }
 0x101   :  { %v359_v25 = vpop.eup %358 }
 0x102   :  { %v136_v26 = vpack.c.bf16 %v359_v25, %v359_v25 }
 0x104   :  { %336 = vmatmul.mubr.bf16.vlgmr.msra.gmra.mrb[0].mxu1 %v136_v26 }
 0x1d7   :  { %v242_v28 = vpop.f32.mrb[0].mxu1 }
 0x1d8   :  { %v243_v29 = vadd.f32 %v272_v27, %v242_v28  ;;  %v337_v30 = vpop.f32.mrb[1].mxu1 }
 0x1d9   :  { %v245_v31 = vpop.f32.mrb[2].mxu1 }
 0x1da   :  { %248 = vst [vmem:[#allocation2] sm:$0xff] %v243_v29  ;;  %v338_v32 = vpop.f32.mrb[3].mxu1 }
 0x1db   :  { %371 = shalt.err (!%p368_p4)
}
 0x1dc   :  { %s372_s4 = scalar_lea.hbm %s491_s5, 128 }
 0x1dd   :  { %p373_p5 = scmp.ne.s32.totalorder %s491_s5, %s372_s4  ;;  %p376_p6 = scmp.lt.u32.totalorder %s372_s4, %s491_s5 }
 0x1df   :  { %p378_p7 = pnand %p376_p6, %p373_p5 }
 0x1e1   :  { %381 = shalt.err (!%p378_p7)
}
 0x1e2   :  { %258 = dma.vmem_to_hbm [thread:$0]  %s256_s3, 128, %s491_s5, [#allocation3]  }
 0x1e3   :  { %382 = dma.done.wait [#allocation3], 128  }
 0x1e4   :  { %383 = vsyncadd [#allocation3], 4294967168 }
 0x1e5   :  { %262 = vsyncpa [#allocation3], 1 }

// kernel: gnn_forward_impl.2
= control target key start
LH: loop header
LB: loop body
LE: loop exit
PB: predicated region body
PF: predicated region fallthrough
CT: control target
= control target key end

     0   :  { %s3175_s0 = inlined_call_operand.hbm [shape: bf16[8,128,128], index: 0, kind: input, shape index: {}]   ;;  %s3176_s1 = inlined_call_operand.hbm [shape: bf16[8,128,128], index: 1, kind: input, shape index: {}]   ;;  %s3177_s2 = inlined_call_operand.hbm [shape: bf16[3,128,128], index: 2, kind: input, shape index: {}]   ;;  %s3178_s3 = inlined_call_operand.hbm [shape: f32[3,1,128], index: 3, kind: input, shape index: {}]   ;;  %s3179_s4 = inlined_call_operand.hbm [shape: f32[8,1,128], index: 4, kind: output, shape index: {}]  }
   0x1   :  { %3187 = sst [smem:[#allocation16_spill]] %s3175_s0 }
   0x2   :  { %9 = vsyncpa [#allocation3], 0 }
   0x3   :  { %11 = vsyncpa [#allocation3 + $0x1], 0 }
   0x4   :  { %12 = vsyncpa [#allocation6], 0 }
   0x5   :  { %14 = vsyncpa [#allocation6 + $0x1], 0 }
   0x6   :  { %15 = vsyncpa [#allocation9], 0 }
   0x7   :  { %16 = vsyncpa [#allocation4], 0 }
   0x8   :  { %18 = vsyncpa [#allocation4 + $0x1], 0  ;;  %s2671_s15 = smov 0   ;;  %s2673_s16 = smov 0  }
   0x9   :  { %s2675_s17 = smov 0   ;;  %s2677_s18 = smov 0  }
   0xa LB: > { %s2692_s19 = sadd.s32 4294967295, %s2635_s18   ;;  %s1781_s20 = sadd.s32 4294967294, %s2635_s18   ;;  %s2635_s18 = sphi %s2677_s18, %s3208_s18   ;;  %s2631_s17 = sphi %s2675_s17, %s3207_s17   ;;  %s2627_s16 = sphi %s2673_s16, %s3206_s16   ;;  %s2623_s15 = sphi %s2671_s15, %s3205_s15  }
   0xb   : > { %p44_p0 = scmp.ne.s32.totalorder %s2627_s16, %s2623_s15  ;;  %p3180_p1 = scmp.eq.s32.totalorder %s2692_s19, 0 }
   0xc   : > { %p142_p3 = scmp.eq.s32.totalorder %s1781_s20, 7  ;;  %p1782_p5 = scmp.ge.s32.totalorder %s2635_s18, 1 }
   0xd   : > { %p2701_p4 = por %p3180_p1, %p44_p0  ;;  %p149_p7 = scmp.lt.s32.totalorder %s2635_s18, 9 }
   0xe   : > { %p2706_p6 = por %p142_p3, %p44_p0  ;;  %s2637_s24 = smov [#allocation7]  }
   0xf   : > { %s3188_s21 = scalar_select %p2701_p4, 1, 0 }
  0x10   : > { %s3189_s22 = scalar_select %p2706_p6, 1, 0 }
  0x11   : > { %p2711_p8 = pnand %p1782_p5, %p149_p7  ;;  %s161_s25 = sshll.u32 %s2637_s24, 4  ;;  %s162_s25 = int_to_ptr.vmem [resolvable:$true] %s161_s25 }
  0x12   : > { %s2638_s27 = smov [#allocation8]   ;;  %s2441_s5 = scalar_lea.hbm %s3177_s2, 3072 }
  0x13   : > { %s3190_s23 = scalar_select %p2711_p8, 1, 0 }
  0x14   : > { %p2195_p9 = pneg %p2711_p8  ;;  %s174_s28 = sshll.u32 %s2638_s27, 4  ;;  %s2723_s28 = int_to_ptr.vmem [resolvable:$true] %s174_s28 }
  0x15   : > { %p2442_p11 = scmp.ne.s32.totalorder %s3177_s2, %s2441_s5  ;;  %p2448_p3 = scmp.lt.u32.totalorder %s2441_s5, %s3177_s2 }
  0x16   : > { %p2719_p10 = pnand %p2195_p9, %p3180_p1 }
  0x18   : > { %p2443_p12 = pneg %p2719_p10 }
  0x1a   : > { %p2444_p13 = pnand %p2443_p12, %p2442_p11 }
  0x1c   : > { %p2445_p0 = pneg %p2444_p13 }
  0x1e   : > { %p2450_p5 = pnand %p2448_p3, %p2445_p0 }
  0x20   : > { %2453 = shalt.err (!%p2450_p5)
}
  0x21   : > { %s2454_s10 = scalar_lea.vmem %s162_s25, 3072  ;;  %p2462_p2 = scmp.lt.s32.totalorder %s162_s25, %s162_s25 }
  0x22   : > { %p2455_p7 = scmp.ne.s32.totalorder %s162_s25, %s2454_s10  ;;  %p2463_p6 = scmp.lt.s32.totalorder %s2454_s10, %s2454_s10 }
  0x24   : > { %p2457_p9 = pnand %p2455_p7, %p2443_p12  ;;  %p2464_p4 = por %p2463_p6, %p2462_p2 }
  0x26   : > { %p2458_p1 = pneg %p2457_p9 }
  0x28   : > { %p2465_p8 = pnand %p2464_p4, %p2458_p1 }
  0x2a   : > { %2468 = shalt.err (!%p2465_p8)
}
  0x2b   : > { %s3183_s11 = smov 64   ;;  %s3185_s12 = smov 4  }
  0x2c   : > { %2198 = dma.hbm_to_vmem [thread:$0]  (!%p2719_p10), %s3177_s2, 3072, %s162_s25, [#allocation6], %s3183_s11, %s3183_s11, %s3185_s12  }
  0x2d   : > { %s2469_s27 = scalar_lea.hbm %s3178_s3, 48 }
  0x2e   : > { %p2470_p1 = scmp.ne.s32.totalorder %s3178_s3, %s2469_s27  ;;  %p2476_p6 = scmp.lt.u32.totalorder %s2469_s27, %s3178_s3 }
  0x30   : > { %p2472_p2 = pnand %p2470_p1, %p2443_p12 }
  0x32   : > { %p2473_p4 = pneg %p2472_p2 }
  0x34   : > { %p2478_p8 = pnand %p2476_p6, %p2473_p4 }
  0x36   : > { %2481 = shalt.err (!%p2478_p8)
}
  0x37   : > { %s2482_s25 = scalar_lea.vmem %s2723_s28, 48  ;;  %s2489_s7 = scalar_lea.vmem %s2723_s28, 64 }
  0x38   : > { %p2483_p11 = scmp.ne.s32.totalorder %s2723_s28, %s2482_s25  ;;  %p2490_p3 = scmp.lt.s32.totalorder %s2723_s28, %s2723_s28 }
  0x39   : > { %p2491_p5 = scmp.lt.s32.totalorder %s2489_s7, %s2482_s25 }
  0x3a   : > { %p2485_p13 = pnand %p2483_p11, %p2443_p12 }
  0x3b   : > { %p2492_p7 = por %p2491_p5, %p2490_p3 }
  0x3c   : > { %p2486_p0 = pneg %p2485_p13 }
  0x3e   : > { %p2493_p9 = pnand %p2492_p7, %p2486_p0 }
  0x40   : > { %2496 = shalt.err (!%p2493_p9)
}
  0x41   : > { %s2641_s8 = smov 16   ;;  %s2642_s9 = smov 1  }
  0x42   : > { %2201 = dma.hbm_to_vmem [thread:$0]  (!%p2719_p10), %s3178_s3, 48, %s2723_s28, [#allocation9], %s2641_s8, %s2641_s8, %s2642_s9  }
  0x43   : > { %s2777_s14 = sadd.s32 1, %s2635_s18   ;;  %s31_s24 = sadd.s32 1, %s2631_s17 }
  0x44   : > { %s28_s20 = ssub.s32 %s2635_s18, %s2777_s14  ;;  %p38_p1 = scmp.ne.s32.totalorder %s2631_s17, %s2627_s16 }
  0x45   : > { %p29_p12 = scmp.eq.s32.totalorder %s28_s20, 0  ;;  %p39_p2 = scmp.eq.s32.totalorder %s2635_s18, 0 }
  0x46   : > { %p3192_p6 = scmp.eq.s32.totalorder %s2692_s19, 7  ;;  %p2215_p11 = scmp.lt.s32.totalorder %s2635_s18, 8 }
  0x47   : > { %s2786_s27 = scalar_select %p29_p12, %s2631_s17, %s31_s24  }
  0x48   : > { %p40_p4 = por %p39_p2, %p38_p1  ;;  %p2790_p8 = por %p3192_p6, %p38_p1 }
  0x49   : > { %s188_s26 = sand.u32 1, %s2631_s17   ;;  %s1891_s28 = sshll.u32 %s2635_s18, 10 }
  0x4a   : > { %s1786_s30 = sshll.u32 %s188_s26, 6  ;;  %s3194_s0 = sld [smem:[#allocation16_spill]] }
  0x4b   : > { %s192_s7 = scalar_lea.vmem [#allocation2], %s1786_s30  ;;  %p2804_p10 = pnand %p2215_p11, %p40_p4 }
  0x4c   : > { %s199_s8 = sshll.u32 %s192_s7, 4  ;;  %s2811_s20 = scalar_lea.hbm %s3176_s1, %s1891_s28  ;;  %s2802_s8 = int_to_ptr.vmem [resolvable:$true] %s199_s8 }
  0x4d   : > { %s213_s24 = scalar_lea.vmem [#allocation5], %s1786_s30  ;;  %s2815_s6 = scalar_lea.sflag [#allocation3], %s188_s26 }
  0x4e   : > { %s2813_s5 = sshll.u32 %s213_s24, 4  ;;  %p2499_p0 = pneg %p2804_p10  ;;  %s2847_s5 = int_to_ptr.vmem [resolvable:$true] %s2813_s5 }
  0x50   : > { %s2800_s25 = scalar_lea.hbm %s3194_s0, %s1891_s28  ;;  %s2502_s10 = scalar_lea.hbm %s3194_s0, 8192 }
  0x51   : > { %s2497_s7 = scalar_lea.hbm %s2800_s25, 1024  ;;  %p2503_p7 = scmp.lt.u32.totalorder %s2800_s25, %s3194_s0 }
  0x52   : > { %p2498_p13 = scmp.ne.s32.totalorder %s2800_s25, %s2497_s7  ;;  %p2504_p9 = scmp.lt.u32.totalorder %s2502_s10, %s2497_s7 }
  0x53   : > { %p2506_p1 = scmp.lt.u32.totalorder %s2497_s7, %s2800_s25 }
  0x54   : > { %p2500_p3 = pnand %p2499_p0, %p2498_p13  ;;  %p2505_p12 = por %p2504_p9, %p2503_p7 }
  0x56   : > { %p2501_p5 = pneg %p2500_p3  ;;  %p2507_p2 = por %p2506_p1, %p2505_p12 }
  0x58   : > { %p2508_p4 = pnand %p2507_p2, %p2501_p5 }
  0x5a   : > { %2511 = shalt.err (!%p2508_p4)
}
  0x5b   : > { %s2512_s26 = scalar_lea.vmem %s2802_s8, 1024  ;;  %s2643_s11 = smov [#allocation2]  }
  0x5c   : > { %p2513_p6 = scmp.ne.s32.totalorder %s2802_s8, %s2512_s26  ;;  %s2517_s12 = sshll.u32 %s2643_s11, 4  ;;  %s2518_s12 = int_to_ptr.vmem [resolvable:$false] %s2517_s12 }
  0x5d   : > { %s2519_s30 = scalar_lea.vmem %s2518_s12, 2048  ;;  %p2520_p3 = scmp.lt.s32.totalorder %s2802_s8, %s2518_s12 }
  0x5e   : > { %p2515_p11 = pnand %p2513_p6, %p2499_p0  ;;  %p2521_p7 = scmp.lt.s32.totalorder %s2519_s30, %s2512_s26 }
  0x60   : > { %p2516_p13 = pneg %p2515_p11  ;;  %p2522_p9 = por %p2521_p7, %p2520_p3 }
  0x62   : > { %p2523_p12 = pnand %p2522_p9, %p2516_p13 }
  0x64   : > { %2526 = shalt.err (!%p2523_p12)
}
  0x65   : > { %s3196_s24 = smov 4   ;;  %s3197_s7 = smov 64  }
  0x66   : > { %2205 = dma.hbm_to_vmem [thread:$0]  (!%p2804_p10), %s2800_s25, 1024, %s2802_s8, %s2815_s6, %s3197_s7, %s3197_s7, %s3196_s24  }
  0x67   : > { %s209_s10 = sand.u32 1, %s2635_s18   ;;  %s2527_s28 = scalar_lea.hbm %s2811_s20, 1024 }
  0x68   : > { %s2850_s13 = scalar_lea.sflag [#allocation6], %s209_s10  ;;  %p2528_p5 = scmp.ne.s32.totalorder %s2811_s20, %s2527_s28 }
  0x69   : > { %s2532_s12 = scalar_lea.hbm %s3176_s1, 8192  ;;  %p2533_p4 = scmp.lt.u32.totalorder %s2811_s20, %s3176_s1 }
  0x6a   : > { %p2530_p1 = pnand %p2528_p5, %p2499_p0  ;;  %p2534_p6 = scmp.lt.u32.totalorder %s2532_s12, %s2527_s28 }
  0x6b   : > { %p2536_p13 = scmp.lt.u32.totalorder %s2527_s28, %s2811_s20 }
  0x6c   : > { %p2531_p2 = pneg %p2530_p1  ;;  %p2535_p11 = por %p2534_p6, %p2533_p4 }
  0x6e   : > { %p2537_p3 = por %p2536_p13, %p2535_p11 }
  0x70   : > { %p2538_p7 = pnand %p2537_p3, %p2531_p2 }
  0x72   : > { %2541 = shalt.err (!%p2538_p7)
}
  0x73   : > { %s2542_s25 = scalar_lea.vmem %s2847_s5, 1024  ;;  %s2644_s8 = smov [#allocation5]  }
  0x74   : > { %p2543_p9 = scmp.ne.s32.totalorder %s2847_s5, %s2542_s25  ;;  %s2547_s6 = sshll.u32 %s2644_s8, 4  ;;  %s2548_s6 = int_to_ptr.vmem [resolvable:$false] %s2547_s6 }
  0x75   : > { %s2549_s0 = scalar_lea.vmem %s2548_s6, 2048  ;;  %p2550_p1 = scmp.lt.s32.totalorder %s2847_s5, %s2548_s6 }
  0x76   : > { %p2545_p12 = pnand %p2543_p9, %p2499_p0  ;;  %p2551_p4 = scmp.lt.s32.totalorder %s2549_s0, %s2542_s25 }
  0x78   : > { %p2546_p5 = pneg %p2545_p12  ;;  %p2552_p6 = por %p2551_p4, %p2550_p1 }
  0x7a   : > { %p2553_p11 = pnand %p2552_p6, %p2546_p5 }
  0x7c   : > { %2556 = shalt.err (!%p2553_p11)
}
  0x7d   : > { %2208 = dma.hbm_to_vmem [thread:$0]  (!%p2804_p10), %s2811_s20, 1024, %s2847_s5, %s2850_s13, %s3197_s7, %s3197_s7, %s3196_s24  }
  0x7e   : > { %p3198_p0 = scmp.ne.s32.totalorder %s3190_s23, 0 }
  0x7f   : > { %s2882_s10 = sand.u32 (!%p3198_p0), 1, %s2627_s16   ;;  %p3199_p2 = scmp.ne.s32.totalorder (!%p3198_p0), %s3188_s21, 0 }
  0x80   : > { %232 = sbr.rel (%p3198_p0) target bundleno = 1671 (0x687), region = 36  ;;  %s1793_s28 = sshll.u32 (!%p3198_p0), %s2882_s10, 6 }
  0x81   : > { %s235_s26 = scalar_lea.sflag (!%p3198_p0), [#allocation3], %s2882_s10  ;;  %s2886_s11 = scalar_lea.vmem (!%p3198_p0), [#allocation2], %s1793_s28 }
  0x87   : > { %2602 = dma.done.wait (%p3199_p2), %s235_s26, 1024  }
  0x88   : > { %2604 = vsyncadd (%p3199_p2), %s235_s26, 4294966272  ;;  %s243_s9 = sand.u32 1, %s2692_s19   ;;  %s2893_s20 = scalar_lea.vmem [#allocation5], %s1793_s28 }
  0x89   : > { %s244_s23 = scalar_lea.sflag [#allocation6], %s243_s9 }
  0x8a   : > { %2606 = dma.done.wait (%p3199_p2), %s244_s23, 1024  }
  0x8b   : > { %2608 = vsyncadd (%p3199_p2), %s244_s23, 4294966272  ;;  %p3200_p10 = scmp.eq.s32.totalorder %s2692_s19, 0 }
  0x8d   : > { %2610 = dma.done.wait (%p3200_p10), [#allocation6], 3072   ;;  %p3201_p13 = pmov %p3200_p10 }
  0x8e   : > { %p3202_p3 = pmov %p3200_p10 }
  0x8f   : > { %2612 = vsyncadd (%p3201_p13), [#allocation6], 4294964224 }
  0x90   : > { %2614 = dma.done.wait (%p3202_p3), [#allocation9], 48   ;;  %p3203_p7 = pmov %p3202_p3 }
  0x91   : > { %v2257_v0 = vld [vmem:[%s2893_s20] sm:$0xff]   ;;  %v2258_v1 = vld [vmem:[%s2893_s20 + $0x8] sm:$0xff]   ;;  %v2259_v2 = vld [vmem:[%s2893_s20 + $0x10] sm:$0xff]   ;;  %s1888_s21 = sshll.u32 %s2692_s19, 4  ;;  %s283_s5 = scalar_lea.vmem [#allocation10], %s2882_s10 }
  0x92   : > { %2616 = vsyncadd (%p3203_p7), [#allocation9], 4294967248  ;;  %1989 = vmatprep.subr.bf16.mxu0 %v2257_v0  ;;  %v2260_v3 = vld [vmem:[%s2893_s20 + $0x18] sm:$0xff]   ;;  %v2912_v4 = vld [vmem:[%s2886_s11] sm:$0xff]   ;;  %s1673_s24 = sshll.u32 %s283_s5, 4  ;;  %s3132_s12 = scalar_lea.hbm %s3179_s4, %s1888_s21  ;;  %s3134_s24 = int_to_ptr.vmem [resolvable:$true] %s1673_s24 }
  0x93   : > { %1990 = vmatpush3.bf16.msra.mxu0 %v2257_v0  ;;  %2005 = vmatprep.mubr.bf16.mxu0 %v2912_v4  ;;  %v2261_v5 = vld [vmem:[%s2893_s20 + $0x20] sm:$0xff]   ;;  %v2262_v6 = vld [vmem:[%s2893_s20 + $0x28] sm:$0xff]   ;;  %v2263_v9 = vld [vmem:[%s2893_s20 + $0x30] sm:$0xff]   ;;  %s1661_s30 = scalar_lea.sflag [#allocation4], %s2882_s10  ;;  %s2557_s25 = scalar_lea.vmem %s3134_s24, 16 }
  0x94   : > { %1991 = vmatprep.subr.bf16.mxu0 %v2258_v1  ;;  %v2273_v7 = vld [vmem:[#allocation7] sm:$0xff]   ;;  %v2274_v8 = vld [vmem:[#allocation7 + $0x8] sm:$0xff]   ;;  %v2275_v10 = vld [vmem:[#allocation7 + $0x10] sm:$0xff]   ;;  %p2558_p9 = scmp.ne.s32.totalorder %s3134_s24, %s2557_s25  ;;  %s2645_s19 = smov [#allocation10]  }
  0x95   : > { %2021 = vmatprep.subr.bf16.mxu1 %v2273_v7  ;;  %v2264_v11 = vld [vmem:[%s2893_s20 + $0x38] sm:$0xff]   ;;  %v2277_v13 = vld [vmem:[#allocation7 + $0x20] sm:$0xff]   ;;  %v2920_v14 = vld [vmem:[%s2886_s11 + $0x8] sm:$0xff]   ;;  %s2561_s8 = sshll.u32 %s2645_s19, 4  ;;  %s2562_s8 = int_to_ptr.vmem [resolvable:$false] %s2561_s8 }
  0x96   : > { %2022 = vmatpush3.bf16.msra.mxu1 %v2273_v7  ;;  %v2276_v12 = vld [vmem:[#allocation7 + $0x18] sm:$0xff]   ;;  %v2923_v15 = vld [vmem:[%s2886_s11 + $0x10] sm:$0xff]   ;;  %v2278_v16 = vld [vmem:[#allocation7 + $0x28] sm:$0xff]   ;;  %p2559_p12 = pnand %p2558_p9, %p2790_p8  ;;  %s2563_s6 = scalar_lea.vmem %s2562_s8, 32 }
  0x97   : > { %1992 = vmatpush3.bf16.msra.mxu0 %v2258_v1  ;;  %2023 = vmatprep.subr.bf16.mxu1 %v2274_v8  ;;  %v2279_v17 = vld [vmem:[#allocation7 + $0x30] sm:$0xff]   ;;  %v2928_v18 = vld [vmem:[%s2886_s11 + $0x18] sm:$0xff]   ;;  %v2931_v19 = vld [vmem:[%s2886_s11 + $0x20] sm:$0xff]   ;;  %p2564_p1 = scmp.lt.s32.totalorder %s3134_s24, %s2562_s8  ;;  %p2565_p4 = scmp.lt.s32.totalorder %s2563_s6, %s2557_s25 }
  0x98   : > { %1993 = vmatprep.subr.bf16.mxu0 %v2259_v2  ;;  %v2936_v20 = vld [vmem:[%s2886_s11 + $0x28] sm:$0xff]   ;;  %v2939_v21 = vld [vmem:[%s2886_s11 + $0x30] sm:$0xff]   ;;  %v2944_v22 = vld [vmem:[%s2886_s11 + $0x38] sm:$0xff]   ;;  %p2560_p5 = pneg %p2559_p12 }
  0x99   : > { %v2280_v23 = vld [vmem:[#allocation7 + $0x38] sm:$0xff]   ;;  %v2281_v48 = vld [vmem:[#allocation7 + $0x40] sm:$0xff]   ;;  %v2282_v49 = vld [vmem:[#allocation7 + $0x48] sm:$0xff]   ;;  %p2566_p6 = por %p2565_p4, %p2564_p1 }
  0x9a   : > { %2024 = vmatpush3.bf16.msra.mxu1 %v2274_v8  ;;  %v2283_v50 = vld [vmem:[#allocation7 + $0x50] sm:$0xff]   ;;  %v2284_v51 = vld [vmem:[#allocation7 + $0x58] sm:$0xff]   ;;  %v2285_v52 = vld [vmem:[#allocation7 + $0x60] sm:$0xff]  }
  0x9b   : > { %1994 = vmatpush3.bf16.msra.mxu0 %v2259_v2  ;;  %2025 = vmatprep.subr.bf16.mxu1 %v2275_v10  ;;  %v2286_v53 = vld [vmem:[#allocation7 + $0x68] sm:$0xff]   ;;  %v2287_v54 = vld [vmem:[#allocation7 + $0x70] sm:$0xff]   ;;  %v2948_v55 = vld [vmem:[#allocation8] ss:$0 sm:$0xff]  ;;  %p2567_p11 = pnand %p2566_p6, %p2560_p5 }
  0x9c   : > { %1995 = vmatprep.subr.bf16.mxu0 %v2260_v3 }
  0x9e   : > { %2026 = vmatpush3.bf16.msra.mxu1 %v2275_v10 }
  0x9f   : > { %1996 = vmatpush3.bf16.msra.mxu0 %v2260_v3  ;;  %2027 = vmatprep.subr.bf16.mxu1 %v2276_v12 }
  0xa0   : > { %1997 = vmatprep.subr.bf16.mxu0 %v2261_v5 }
  0xa2   : > { %2028 = vmatpush3.bf16.msra.mxu1 %v2276_v12 }
  0xa3   : > { %1998 = vmatpush3.bf16.msra.mxu0 %v2261_v5  ;;  %2029 = vmatprep.subr.bf16.mxu1 %v2277_v13 }
  0xa4   : > { %1999 = vmatprep.subr.bf16.mxu0 %v2262_v6 }
  0xa6   : > { %2030 = vmatpush3.bf16.msra.mxu1 %v2277_v13 }
  0xa7   : > { %2000 = vmatpush3.bf16.msra.mxu0 %v2262_v6  ;;  %2031 = vmatprep.subr.bf16.mxu1 %v2278_v16 }
  0xa8   : > { %2001 = vmatprep.subr.bf16.mxu0 %v2263_v9 }
  0xaa   : > { %2032 = vmatpush3.bf16.msra.mxu1 %v2278_v16 }
  0xab   : > { %2002 = vmatpush3.bf16.msra.mxu0 %v2263_v9  ;;  %2033 = vmatprep.subr.bf16.mxu1 %v2279_v17 }
  0xac   : > { %2003 = vmatprep.subr.bf16.mxu0 %v2264_v11 }
  0xae   : > { %2034 = vmatpush3.bf16.msra.mxu1 %v2279_v17 }
  0xaf   : > { %2004 = vmatpush3.bf16.msra.mxu0 %v2264_v11  ;;  %2035 = vmatprep.subr.bf16.mxu1 %v2280_v23 }
  0xb2   : > { %2006 = vmatmul.mubr.bf16.vlgmr.msra.gmra.mrb[0].mxu0 %v2920_v14  ;;  %2036 = vmatpush3.bf16.msra.mxu1 %v2280_v23 }
  0xb3   : > { %2009 = vmatprep.mubr.bf16.mxu0 %v2923_v15  ;;  %2085 = vmatprep.subr.bf16.mxu1 %v2281_v48 }
  0xba   : > { %2010 = vmatmul.mubr.bf16.gmra.mrb[4].mxu0 %v2928_v18 }
  0xbb   : > { %2013 = vmatprep.mubr.bf16.mxu0 %v2931_v19 }
  0xc2   : > { %2014 = vmatmul.mubr.bf16.gmra.mrb[8].mxu0 %v2936_v20 }
  0xc3   : > { %2017 = vmatprep.mubr.bf16.mxu0 %v2939_v21 }
  0xca   : > { %2018 = vmatmul.mubr.bf16.gmra.mrb[12].mxu0 %v2944_v22 }
  0xcb   : > { %2069 = vmatprep.mubr.bf16.mxu0 %v2912_v4 }
 0x185   : > { %v2007_v24 = vpop.f32.mrb[0].mxu0 }
 0x186   : > { %v464_v25 = vpop.f32.mrb[1].mxu0 }
 0x187   : > { %v2008_v26 = vpop.f32.mrb[2].mxu0 }
 0x188   : > { %v528_v27 = vpack.c.bf16 %v2008_v26, %v2007_v24  ;;  %v467_v28 = vpop.f32.mrb[3].mxu0 }
 0x189   : > { %v527_v29 = vpack.c.bf16 %v467_v28, %v464_v25 }
 0x18b   : > { %2037 = vmatprep.mubr.bf16.mxu1 %v527_v29 }
 0x18c   : > { %2038 = vmatmul.mubr.bf16.vlgmr.msra.gmra.mrb[0].mxu1 %v528_v27 }
 0x18d   : > { %v2011_v30 = vpop.f32.mrb[4].mxu0  ;;  %2086 = vmatpush3.bf16.msra.mxu1 %v2281_v48 }
 0x18e   : > { %v480_v31 = vpop.f32.mrb[5].mxu0  ;;  %2087 = vmatprep.subr.bf16.mxu1 %v2282_v49 }
 0x18f   : > { %v2012_v32 = vpop.f32.mrb[6].mxu0 }
 0x190   : > { %v530_v33 = vpack.c.bf16 %v2012_v32, %v2011_v30  ;;  %v483_v34 = vpop.f32.mrb[7].mxu0 }
 0x191   : > { %v529_v35 = vpack.c.bf16 %v483_v34, %v480_v31  ;;  %2088 = vmatpush3.bf16.msra.mxu1 %v2282_v49 }
 0x192   : > { %2089 = vmatprep.subr.bf16.mxu1 %v2283_v50 }
 0x193   : > { %2041 = vmatprep.mubr.bf16.mxu1 %v529_v35 }
 0x194   : > { %2042 = vmatmul.mubr.bf16.gmra.mrb[4].mxu1 %v530_v33 }
 0x195   : > { %v2015_v36 = vpop.f32.mrb[8].mxu0  ;;  %2090 = vmatpush3.bf16.msra.mxu1 %v2283_v50 }
 0x196   : > { %v496_v37 = vpop.f32.mrb[9].mxu0  ;;  %2091 = vmatprep.subr.bf16.mxu1 %v2284_v51 }
 0x197   : > { %v2016_v38 = vpop.f32.mrb[10].mxu0 }
 0x198   : > { %v532_v39 = vpack.c.bf16 %v2016_v38, %v2015_v36  ;;  %v499_v40 = vpop.f32.mrb[11].mxu0 }
 0x199   : > { %v531_v41 = vpack.c.bf16 %v499_v40, %v496_v37  ;;  %2092 = vmatpush3.bf16.msra.mxu1 %v2284_v51 }
 0x19a   : > { %2093 = vmatprep.subr.bf16.mxu1 %v2285_v52 }
 0x19b   : > { %2045 = vmatprep.mubr.bf16.mxu1 %v531_v41 }
 0x19c   : > { %2046 = vmatmul.mubr.bf16.gmra.mrb[8].mxu1 %v532_v39 }
 0x19d   : > { %v2019_v42 = vpop.f32.mrb[12].mxu0  ;;  %2094 = vmatpush3.bf16.msra.mxu1 %v2285_v52 }
 0x19e   : > { %v512_v43 = vpop.f32.mrb[13].mxu0  ;;  %2095 = vmatprep.subr.bf16.mxu1 %v2286_v53 }
 0x19f   : > { %v2020_v44 = vpop.f32.mrb[14].mxu0 }
 0x1a0   : > { %v534_v45 = vpack.c.bf16 %v2020_v44, %v2019_v42  ;;  %v515_v46 = vpop.f32.mrb[15].mxu0 }
 0x1a1   : > { %v533_v47 = vpack.c.bf16 %v515_v46, %v512_v43  ;;  %2096 = vmatpush3.bf16.msra.mxu1 %v2286_v53 }
 0x1a2   : > { %2097 = vmatprep.subr.bf16.mxu1 %v2287_v54 }
 0x1a3   : > { %2049 = vmatprep.mubr.bf16.mxu1 %v533_v47 }
 0x1a4   : > { %2050 = vmatmul.mubr.bf16.gmra.mrb[12].mxu1 %v534_v45 }
 0x1a5   : > { %2098 = vmatpush3.bf16.msra.mxu1 %v2287_v54 }
 0x25f   : > { %v2039_v56 = vpop.f32.mrb[0].mxu1 }
 0x260   : > { %v2951_v57 = vadd.f32 %v2039_v56, %v2948_v55  ;;  %v623_v58 = vpop.f32.mrb[1].mxu1 }
 0x261   : > { %v2954_v59 = vadd.f32 %v2948_v55, %v623_v58  ;;  %v2040_v60 = vpop.f32.mrb[2].mxu1 }
 0x262   : > { %v1824_v61 = vmul.f32 -1.442695, %v2951_v57  ;;  %v2958_v62 = vadd.f32 %v2040_v60, %v2948_v55  ;;  %v626_v63 = vpop.f32.mrb[3].mxu1 }
 0x263   : > { %v1822_v0 = vmul.f32 -1.442695, %v2954_v59  ;;  %v2962_v1 = vadd.f32 %v2948_v55, %v626_v63 }
 0x264   : > { %2297 = vpow2.f32 %v1824_v61  ;;  %v1825_v2 = vmul.f32 -1.442695, %v2958_v62 }
 0x265   : > { %2299 = vpow2.f32 %v1822_v0  ;;  %v1823_v3 = vmul.f32 -1.442695, %v2962_v1 }
 0x266   : > { %2301 = vpow2.f32 %v1825_v2 }
 0x267   : > { %2303 = vpow2.f32 %v1823_v3  ;;  %v2043_v5 = vpop.f32.mrb[4].mxu1 }
 0x268   : > { %v2967_v6 = vadd.f32 %v2043_v5, %v2948_v55  ;;  %v639_v7 = vpop.f32.mrb[5].mxu1 }
 0x269   : > { %v2970_v8 = vadd.f32 %v2948_v55, %v639_v7  ;;  %v2044_v9 = vpop.f32.mrb[6].mxu1 }
 0x26a   : > { %v1828_v10 = vmul.f32 -1.442695, %v2967_v6  ;;  %v2974_v11 = vadd.f32 %v2044_v9, %v2948_v55  ;;  %v642_v12 = vpop.f32.mrb[7].mxu1 }
 0x26b   : > { %v1826_v13 = vmul.f32 -1.442695, %v2970_v8  ;;  %v2978_v16 = vadd.f32 %v2948_v55, %v642_v12 }
 0x26c   : > { %2305 = vpow2.f32 %v1828_v10  ;;  %v1829_v17 = vmul.f32 -1.442695, %v2974_v11 }
 0x26d   : > { %2307 = vpow2.f32 %v1826_v13  ;;  %v1827_v23 = vmul.f32 -1.442695, %v2978_v16 }
 0x26e   : > { %v2298_v24 = vpop.eup %2297  ;;  %2309 = vpow2.f32 %v1829_v17 }
 0x26f   : > { %v2300_v25 = vpop.eup %2299  ;;  %v736_v26 = vadd.f32 1.0, %v2298_v24  ;;  %2311 = vpow2.f32 %v1827_v23  ;;  %v2047_v27 = vpop.f32.mrb[8].mxu1 }
 0x270   : > { %v2302_v28 = vpop.eup %2301  ;;  %v734_v29 = vadd.f32 1.0, %v2300_v25  ;;  %v2983_v30 = vadd.f32 %v2047_v27, %v2948_v55  ;;  %v655_v31 = vpop.f32.mrb[9].mxu1 }
 0x271   : > { %v2304_v32 = vpop.eup %2303  ;;  %2313 = vrcp.f32 %v736_v26  ;;  %v737_v33 = vadd.f32 1.0, %v2302_v28  ;;  %v2986_v34 = vadd.f32 %v2948_v55, %v655_v31  ;;  %v2048_v35 = vpop.f32.mrb[10].mxu1 }
 0x272   : > { %2315 = vrcp.f32 %v734_v29  ;;  %v735_v36 = vadd.f32 1.0, %v2304_v32  ;;  %v1832_v37 = vmul.f32 -1.442695, %v2983_v30  ;;  %v2990_v38 = vadd.f32 %v2048_v35, %v2948_v55  ;;  %v658_v39 = vpop.f32.mrb[11].mxu1 }
 0x273   : > { %2317 = vrcp.f32 %v737_v33  ;;  %v1830_v40 = vmul.f32 -1.442695, %v2986_v34  ;;  %v2994_v41 = vadd.f32 %v2948_v55, %v658_v39 }
 0x274   : > { %2319 = vrcp.f32 %v735_v36  ;;  %v1833_v42 = vmul.f32 -1.442695, %v2990_v38 }
 0x275   : > { %2321 = vpow2.f32 %v1832_v37  ;;  %v1831_v43 = vmul.f32 -1.442695, %v2994_v41 }
 0x276   : > { %v2306_v44 = vpop.eup %2305  ;;  %2323 = vpow2.f32 %v1830_v40 }
 0x277   : > { %v2308_v45 = vpop.eup %2307  ;;  %v740_v46 = vadd.f32 1.0, %v2306_v44  ;;  %2325 = vpow2.f32 %v1833_v42  ;;  %v2051_v47 = vpop.f32.mrb[12].mxu1 }
 0x278   : > { %v2310_v48 = vpop.eup %2309  ;;  %v738_v49 = vadd.f32 1.0, %v2308_v45  ;;  %2327 = vpow2.f32 %v1831_v43  ;;  %v2999_v50 = vadd.f32 %v2051_v47, %v2948_v55  ;;  %v671_v51 = vpop.f32.mrb[13].mxu1 }
 0x279   : > { %v2312_v52 = vpop.eup %2311  ;;  %2329 = vrcp.f32 %v740_v46  ;;  %v741_v53 = vadd.f32 1.0, %v2310_v48  ;;  %v3002_v54 = vadd.f32 %v2948_v55, %v671_v51  ;;  %v2052_v56 = vpop.f32.mrb[14].mxu1 }
 0x27a   : > { %2331 = vrcp.f32 %v738_v49  ;;  %v739_v58 = vadd.f32 1.0, %v2312_v52  ;;  %v1836_v60 = vmul.f32 -1.442695, %v2999_v50  ;;  %v3006_v61 = vadd.f32 %v2052_v56, %v2948_v55  ;;  %v674_v63 = vpop.f32.mrb[15].mxu1 }
 0x27b   : > { %v2314_v0 = vpop.eup %2313  ;;  %2333 = vrcp.f32 %v741_v53  ;;  %v1834_v2 = vmul.f32 -1.442695, %v3002_v54  ;;  %v3010_v3 = vadd.f32 %v2948_v55, %v674_v63 }
 0x27c   : > { %v2316_v5 = vpop.eup %2315  ;;  %2335 = vrcp.f32 %v739_v58  ;;  %v1837_v7 = vmul.f32 -1.442695, %v3006_v61  ;;  %v784_v13 = vmul.f32 %v2314_v0, %v2951_v57 }
 0x27d   : > { %v2318_v9 = vpop.eup %2317  ;;  %2337 = vpow2.f32 %v1836_v60  ;;  %v1835_v10 = vmul.f32 -1.442695, %v3010_v3  ;;  %v782_v24 = vmul.f32 %v2316_v5, %v2954_v59 }
 0x27e   : > { %v2320_v12 = vpop.eup %2319  ;;  %v785_v17 = vmul.f32 %v2318_v9, %v2958_v62  ;;  %2339 = vpow2.f32 %v1834_v2 }
 0x27f   : > { %v2322_v23 = vpop.eup %2321  ;;  %v783_v55 = vmul.f32 %v2320_v12, %v2962_v1  ;;  %2341 = vpow2.f32 %v1837_v7 }
 0x280   : > { %v2324_v25 = vpop.eup %2323  ;;  %v744_v26 = vadd.f32 1.0, %v2322_v23  ;;  %2343 = vpow2.f32 %v1835_v10  ;;  %v799_v27 = vpack.c.bf16 %v785_v17, %v784_v13 }
 0x281   : > { %v2326_v28 = vpop.eup %2325  ;;  %v742_v29 = vadd.f32 1.0, %v2324_v25  ;;  %v798_v31 = vpack.c.bf16 %v783_v55, %v782_v24 }
 0x282   : > { %v2328_v32 = vpop.eup %2327  ;;  %2345 = vrcp.f32 %v744_v26  ;;  %v745_v33 = vadd.f32 1.0, %v2326_v28 }
 0x283   : > { %v2330_v57 = vpop.eup %2329  ;;  %2347 = vrcp.f32 %v742_v29  ;;  %v743_v62 = vadd.f32 1.0, %v2328_v32  ;;  %2053 = vmatprep.subr.bf16.mxu0 %v798_v31 }
 0x284   : > { %v2332_v35 = vpop.eup %2331  ;;  %2349 = vrcp.f32 %v745_v33  ;;  %2054 = vmatpush3.bf16.msra.mxu0 %v798_v31  ;;  %v788_v36 = vmul.f32 %v2330_v57, %v2967_v6 }
 0x285   : > { %v2334_v59 = vpop.eup %2333  ;;  %2351 = vrcp.f32 %v743_v62  ;;  %2055 = vmatprep.subr.bf16.mxu0 %v799_v27  ;;  %v786_v40 = vmul.f32 %v2332_v35, %v2970_v8 }
 0x286   : > { %v2336_v1 = vpop.eup %2335  ;;  %v789_v37 = vmul.f32 %v2334_v59, %v2974_v11 }
 0x287   : > { %v2338_v39 = vpop.eup %2337  ;;  %v787_v42 = vmul.f32 %v2336_v1, %v2978_v16 }
 0x288   : > { %v2340_v43 = vpop.eup %2339  ;;  %v748_v44 = vadd.f32 1.0, %v2338_v39  ;;  %2056 = vmatpush3.bf16.msra.mxu0 %v799_v27  ;;  %v801_v45 = vpack.c.bf16 %v789_v37, %v788_v36  ;;  %v2289_v39 = vld [vmem:[#allocation7 + $0x80] sm:$0xff]  }
 0x289   : > { %v2342_v46 = vpop.eup %2341  ;;  %v746_v47 = vadd.f32 1.0, %v2340_v43  ;;  %v800_v48 = vpack.c.bf16 %v787_v42, %v786_v40  ;;  %v2290_v40 = vld [vmem:[#allocation7 + $0x88] sm:$0xff]   ;;  %v2291_v42 = vld [vmem:[#allocation7 + $0x90] sm:$0xff]   ;;  %v2292_v43 = vld [vmem:[#allocation7 + $0x98] sm:$0xff]  }
 0x28a   : > { %v2344_v49 = vpop.eup %2343  ;;  %2353 = vrcp.f32 %v748_v44  ;;  %v749_v51 = vadd.f32 1.0, %v2342_v46  ;;  %v2293_v44 = vld [vmem:[#allocation7 + $0xa0] sm:$0xff]   ;;  %v2295_v46 = vld [vmem:[#allocation7 + $0xb0] sm:$0xff]  }
 0x28b   : > { %2355 = vrcp.f32 %v746_v47  ;;  %v747_v52 = vadd.f32 1.0, %v2344_v49  ;;  %2057 = vmatprep.subr.bf16.mxu0 %v800_v48  ;;  %v3038_v47 = vld [vmem:[#allocation8 + $0x1] ss:$0 sm:$0xff] }
 0x28c   : > { %v2346_v6 = vpop.eup %2345  ;;  %2357 = vrcp.f32 %v749_v51  ;;  %2058 = vmatpush3.bf16.msra.mxu0 %v800_v48 }
 0x28d   : > { %v2348_v11 = vpop.eup %2347  ;;  %2359 = vrcp.f32 %v747_v52  ;;  %2059 = vmatprep.subr.bf16.mxu0 %v801_v45  ;;  %v792_v53 = vmul.f32 %v2346_v6, %v2983_v30 }
 0x28e   : > { %v2350_v8 = vpop.eup %2349  ;;  %v790_v58 = vmul.f32 %v2348_v11, %v2986_v34 }
 0x28f   : > { %v2352_v16 = vpop.eup %2351  ;;  %v793_v56 = vmul.f32 %v2350_v8, %v2990_v38 }
 0x290   : > { %v791_v60 = vmul.f32 %v2352_v16, %v2994_v41  ;;  %2060 = vmatpush3.bf16.msra.mxu0 %v801_v45  ;;  %v2294_v45 = vld [vmem:[#allocation7 + $0xa8] sm:$0xff]  }
 0x291   : > { %v803_v63 = vpack.c.bf16 %v793_v56, %v792_v53 }
 0x292   : > { %v802_v0 = vpack.c.bf16 %v791_v60, %v790_v58 }
 0x294   : > { %v2354_v2 = vpop.eup %2353  ;;  %2061 = vmatprep.subr.bf16.mxu0 %v802_v0 }
 0x295   : > { %v2356_v5 = vpop.eup %2355  ;;  %2062 = vmatpush3.bf16.msra.mxu0 %v802_v0  ;;  %v796_v10 = vmul.f32 %v2354_v2, %v2999_v50  ;;  %v2288_v50 = vld [vmem:[#allocation7 + $0x78] sm:$0xff]  }
 0x296   : > { %v2358_v7 = vpop.eup %2357  ;;  %2063 = vmatprep.subr.bf16.mxu0 %v803_v63  ;;  %v794_v38 = vmul.f32 %v2356_v5, %v3002_v54  ;;  %2099 = vmatprep.subr.bf16.mxu1 %v2288_v50 }
 0x297   : > { %v2360_v9 = vpop.eup %2359  ;;  %v797_v30 = vmul.f32 %v2358_v7, %v3006_v61  ;;  %2100 = vmatpush3.bf16.msra.mxu1 %v2288_v50 }
 0x298   : > { %v795_v34 = vmul.f32 %v2360_v9, %v3010_v3  ;;  %2149 = vmatprep.subr.bf16.mxu1 %v2289_v39 }
 0x299   : > { %2064 = vmatpush3.bf16.msra.mxu0 %v803_v63  ;;  %v805_v41 = vpack.c.bf16 %v797_v30, %v796_v10 }
 0x29a   : > { %v804_v12 = vpack.c.bf16 %v795_v34, %v794_v38 }
 0x29c   : > { %2065 = vmatprep.subr.bf16.mxu0 %v804_v12 }
 0x29d   : > { %2066 = vmatpush3.bf16.msra.mxu0 %v804_v12 }
 0x29e   : > { %2067 = vmatprep.subr.bf16.mxu0 %v805_v41 }
 0x2a1   : > { %2068 = vmatpush3.bf16.msra.mxu0 %v805_v41 }
 0x2a4   : > { %2070 = vmatmul.mubr.bf16.vlgmr.msra.gmra.mrb[16].mxu0 %v2920_v14 }
 0x2a5   : > { %2073 = vmatprep.mubr.bf16.mxu0 %v2923_v15 }
 0x2ac   : > { %2074 = vmatmul.mubr.bf16.gmra.mrb[20].mxu0 %v2928_v18 }
 0x2ad   : > { %2077 = vmatprep.mubr.bf16.mxu0 %v2931_v19 }
 0x2b4   : > { %2078 = vmatmul.mubr.bf16.gmra.mrb[24].mxu0 %v2936_v20 }
 0x2b5   : > { %2081 = vmatprep.mubr.bf16.mxu0 %v2939_v21 }
 0x2bc   : > { %2082 = vmatmul.mubr.bf16.gmra.mrb[28].mxu0 %v2944_v22 }
 0x2bd   : > { %2133 = vmatprep.mubr.bf16.mxu0 %v2912_v4 }
 0x377   : > { %v2071_v54 = vpop.f32.mrb[16].mxu0 }
 0x378   : > { %v859_v61 = vpop.f32.mrb[17].mxu0 }
 0x379   : > { %v2072_v3 = vpop.f32.mrb[18].mxu0 }
 0x37a   : > { %v923_v13 = vpack.c.bf16 %v2072_v3, %v2071_v54  ;;  %v862_v17 = vpop.f32.mrb[19].mxu0 }
 0x37b   : > { %v922_v23 = vpack.c.bf16 %v862_v17, %v859_v61 }
 0x37d   : > { %2101 = vmatprep.mubr.bf16.mxu1 %v922_v23 }
 0x37e   : > { %2102 = vmatmul.mubr.bf16.vlgmr.msra.gmra.mrb[16].mxu1 %v923_v13 }
 0x37f   : > { %v2075_v24 = vpop.f32.mrb[20].mxu0  ;;  %2150 = vmatpush3.bf16.msra.mxu1 %v2289_v39 }
 0x380   : > { %v875_v55 = vpop.f32.mrb[21].mxu0  ;;  %2151 = vmatprep.subr.bf16.mxu1 %v2290_v40 }
 0x381   : > { %v2076_v25 = vpop.f32.mrb[22].mxu0 }
 0x382   : > { %v925_v26 = vpack.c.bf16 %v2076_v25, %v2075_v24  ;;  %v878_v27 = vpop.f32.mrb[23].mxu0 }
 0x383   : > { %v924_v28 = vpack.c.bf16 %v878_v27, %v875_v55  ;;  %2152 = vmatpush3.bf16.msra.mxu1 %v2290_v40 }
 0x384   : > { %2153 = vmatprep.subr.bf16.mxu1 %v2291_v42 }
 0x385   : > { %2105 = vmatprep.mubr.bf16.mxu1 %v924_v28 }
 0x386   : > { %2106 = vmatmul.mubr.bf16.gmra.mrb[20].mxu1 %v925_v26 }
 0x387   : > { %v2079_v4 = vpop.f32.mrb[24].mxu0  ;;  %2154 = vmatpush3.bf16.msra.mxu1 %v2291_v42 }
 0x388   : > { %v891_v29 = vpop.f32.mrb[25].mxu0  ;;  %2155 = vmatprep.subr.bf16.mxu1 %v2292_v43 }
 0x389   : > { %v2080_v31 = vpop.f32.mrb[26].mxu0 }
 0x38a   : > { %v927_v32 = vpack.c.bf16 %v2080_v31, %v2079_v4  ;;  %v894_v33 = vpop.f32.mrb[27].mxu0 }
 0x38b   : > { %v926_v57 = vpack.c.bf16 %v894_v33, %v891_v29  ;;  %2156 = vmatpush3.bf16.msra.mxu1 %v2292_v43 }
 0x38c   : > { %2157 = vmatprep.subr.bf16.mxu1 %v2293_v44 }
 0x38d   : > { %2109 = vmatprep.mubr.bf16.mxu1 %v926_v57 }
 0x38e   : > { %2110 = vmatmul.mubr.bf16.gmra.mrb[24].mxu1 %v927_v32 }
 0x38f   : > { %v2083_v62 = vpop.f32.mrb[28].mxu0  ;;  %2158 = vmatpush3.bf16.msra.mxu1 %v2293_v44 }
 0x390   : > { %v907_v35 = vpop.f32.mrb[29].mxu0  ;;  %2159 = vmatprep.subr.bf16.mxu1 %v2294_v45 }
 0x391   : > { %v2084_v59 = vpop.f32.mrb[30].mxu0 }
 0x392   : > { %v929_v1 = vpack.c.bf16 %v2084_v59, %v2083_v62  ;;  %v910_v36 = vpop.f32.mrb[31].mxu0 }
 0x393   : > { %v928_v37 = vpack.c.bf16 %v910_v36, %v907_v35  ;;  %2160 = vmatpush3.bf16.msra.mxu1 %v2294_v45 }
 0x394   : > { %2161 = vmatprep.subr.bf16.mxu1 %v2295_v46 }
 0x395   : > { %2113 = vmatprep.mubr.bf16.mxu1 %v928_v37 }
 0x396   : > { %2114 = vmatmul.mubr.bf16.gmra.mrb[28].mxu1 %v929_v1 }
 0x397   : > { %2162 = vmatpush3.bf16.msra.mxu1 %v2295_v46 }
 0x451   : > { %v2103_v48 = vpop.f32.mrb[16].mxu1 }
 0x452   : > { %v3041_v49 = vadd.f32 %v2103_v48, %v3038_v47  ;;  %v1018_v51 = vpop.f32.mrb[17].mxu1 }
 0x453   : > { %v3044_v52 = vadd.f32 %v3038_v47, %v1018_v51  ;;  %v2104_v6 = vpop.f32.mrb[18].mxu1 }
 0x454   : > { %v1849_v11 = vmul.f32 -1.442695, %v3041_v49  ;;  %v3048_v8 = vadd.f32 %v2104_v6, %v3038_v47  ;;  %v1021_v16 = vpop.f32.mrb[19].mxu1 }
 0x455   : > { %v1847_v53 = vmul.f32 -1.442695, %v3044_v52  ;;  %v3052_v56 = vadd.f32 %v3038_v47, %v1021_v16 }
 0x456   : > { %2361 = vpow2.f32 %v1849_v11  ;;  %v1850_v58 = vmul.f32 -1.442695, %v3048_v8 }
 0x457   : > { %2363 = vpow2.f32 %v1847_v53  ;;  %v1848_v60 = vmul.f32 -1.442695, %v3052_v56 }
 0x458   : > { %2365 = vpow2.f32 %v1850_v58 }
 0x459   : > { %2367 = vpow2.f32 %v1848_v60  ;;  %v2107_v63 = vpop.f32.mrb[20].mxu1 }
 0x45a   : > { %v3057_v0 = vadd.f32 %v2107_v63, %v3038_v47  ;;  %v1034_v2 = vpop.f32.mrb[21].mxu1 }
 0x45b   : > { %v3060_v5 = vadd.f32 %v3038_v47, %v1034_v2  ;;  %v2108_v7 = vpop.f32.mrb[22].mxu1 }
 0x45c   : > { %v1853_v9 = vmul.f32 -1.442695, %v3057_v0  ;;  %v3064_v10 = vadd.f32 %v2108_v7, %v3038_v47  ;;  %v1037_v30 = vpop.f32.mrb[23].mxu1 }
 0x45d   : > { %v1851_v38 = vmul.f32 -1.442695, %v3060_v5  ;;  %v3068_v34 = vadd.f32 %v3038_v47, %v1037_v30 }
 0x45e   : > { %2369 = vpow2.f32 %v1853_v9  ;;  %v1854_v41 = vmul.f32 -1.442695, %v3064_v10 }
 0x45f   : > { %2371 = vpow2.f32 %v1851_v38  ;;  %v1852_v12 = vmul.f32 -1.442695, %v3068_v34 }
 0x460   : > { %v2362_v50 = vpop.eup %2361  ;;  %2373 = vpow2.f32 %v1854_v41 }
 0x461   : > { %v2364_v54 = vpop.eup %2363  ;;  %v1131_v61 = vadd.f32 1.0, %v2362_v50  ;;  %2375 = vpow2.f32 %v1852_v12  ;;  %v2111_v3 = vpop.f32.mrb[24].mxu1 }
 0x462   : > { %v2366_v13 = vpop.eup %2365  ;;  %v1129_v17 = vadd.f32 1.0, %v2364_v54  ;;  %v3073_v23 = vadd.f32 %v2111_v3, %v3038_v47  ;;  %v1050_v24 = vpop.f32.mrb[25].mxu1 }
 0x463   : > { %v2368_v55 = vpop.eup %2367  ;;  %2377 = vrcp.f32 %v1131_v61  ;;  %v1132_v25 = vadd.f32 1.0, %v2366_v13  ;;  %v3076_v26 = vadd.f32 %v3038_v47, %v1050_v24  ;;  %v2112_v27 = vpop.f32.mrb[26].mxu1 }
 0x464   : > { %2379 = vrcp.f32 %v1129_v17  ;;  %v1130_v28 = vadd.f32 1.0, %v2368_v55  ;;  %v1857_v4 = vmul.f32 -1.442695, %v3073_v23  ;;  %v3080_v29 = vadd.f32 %v2112_v27, %v3038_v47  ;;  %v1053_v31 = vpop.f32.mrb[27].mxu1 }
 0x465   : > { %2381 = vrcp.f32 %v1132_v25  ;;  %v1855_v32 = vmul.f32 -1.442695, %v3076_v26  ;;  %v3084_v33 = vadd.f32 %v3038_v47, %v1053_v31 }
 0x466   : > { %2383 = vrcp.f32 %v1130_v28  ;;  %v1858_v57 = vmul.f32 -1.442695, %v3080_v29 }
 0x467   : > { %2385 = vpow2.f32 %v1857_v4  ;;  %v1856_v62 = vmul.f32 -1.442695, %v3084_v33 }
 0x468   : > { %v2370_v35 = vpop.eup %2369  ;;  %2387 = vpow2.f32 %v1855_v32 }
 0x469   : > { %v2372_v59 = vpop.eup %2371  ;;  %v1135_v1 = vadd.f32 1.0, %v2370_v35  ;;  %2389 = vpow2.f32 %v1858_v57  ;;  %v2115_v36 = vpop.f32.mrb[28].mxu1 }
 0x46a   : > { %v2374_v37 = vpop.eup %2373  ;;  %v1133_v39 = vadd.f32 1.0, %v2372_v59  ;;  %2391 = vpow2.f32 %v1856_v62  ;;  %v3089_v40 = vadd.f32 %v2115_v36, %v3038_v47  ;;  %v1066_v42 = vpop.f32.mrb[29].mxu1 }
 0x46b   : > { %v2376_v43 = vpop.eup %2375  ;;  %2393 = vrcp.f32 %v1135_v1  ;;  %v1136_v44 = vadd.f32 1.0, %v2374_v37  ;;  %v3092_v45 = vadd.f32 %v3038_v47, %v1066_v42  ;;  %v2116_v46 = vpop.f32.mrb[30].mxu1 }
 0x46c   : > { %2395 = vrcp.f32 %v1133_v39  ;;  %v1134_v48 = vadd.f32 1.0, %v2376_v43  ;;  %v1861_v51 = vmul.f32 -1.442695, %v3089_v40  ;;  %v3096_v6 = vadd.f32 %v2116_v46, %v3038_v47  ;;  %v1069_v11 = vpop.f32.mrb[31].mxu1 }
 0x46d   : > { %v2378_v16 = vpop.eup %2377  ;;  %2397 = vrcp.f32 %v1136_v44  ;;  %v1859_v53 = vmul.f32 -1.442695, %v3092_v45  ;;  %v3100_v58 = vadd.f32 %v3038_v47, %v1069_v11 }
 0x46e   : > { %v2380_v60 = vpop.eup %2379  ;;  %2399 = vrcp.f32 %v1134_v48  ;;  %v1862_v63 = vmul.f32 -1.442695, %v3096_v6  ;;  %v1179_v30 = vmul.f32 %v2378_v16, %v3041_v49 }
 0x46f   : > { %v2382_v2 = vpop.eup %2381  ;;  %2401 = vpow2.f32 %v1861_v51  ;;  %v1860_v7 = vmul.f32 -1.442695, %v3100_v58  ;;  %v1177_v12 = vmul.f32 %v2380_v60, %v3044_v52 }
 0x470   : > { %v2384_v9 = vpop.eup %2383  ;;  %v1180_v38 = vmul.f32 %v2382_v2, %v3048_v8  ;;  %2403 = vpow2.f32 %v1859_v53 }
 0x471   : > { %v2386_v41 = vpop.eup %2385  ;;  %v1178_v47 = vmul.f32 %v2384_v9, %v3052_v56  ;;  %2405 = vpow2.f32 %v1862_v63 }
 0x472   : > { %v2388_v50 = vpop.eup %2387  ;;  %v1139_v54 = vadd.f32 1.0, %v2386_v41  ;;  %2407 = vpow2.f32 %v1860_v7  ;;  %v1194_v61 = vpack.c.bf16 %v1180_v38, %v1179_v30 }
 0x473   : > { %v2390_v3 = vpop.eup %2389  ;;  %v1137_v13 = vadd.f32 1.0, %v2388_v50  ;;  %v1193_v17 = vpack.c.bf16 %v1178_v47, %v1177_v12 }
 0x474   : > { %v2392_v24 = vpop.eup %2391  ;;  %2409 = vrcp.f32 %v1139_v54  ;;  %v1140_v55 = vadd.f32 1.0, %v2390_v3 }
 0x475   : > { %v2394_v49 = vpop.eup %2393  ;;  %2411 = vrcp.f32 %v1137_v13  ;;  %v1138_v8 = vadd.f32 1.0, %v2392_v24  ;;  %2117 = vmatprep.subr.bf16.mxu0 %v1193_v17 }
 0x476   : > { %v2396_v25 = vpop.eup %2395  ;;  %2413 = vrcp.f32 %v1140_v55  ;;  %2118 = vmatpush3.bf16.msra.mxu0 %v1193_v17  ;;  %v1183_v27 = vmul.f32 %v2394_v49, %v3057_v0  ;;  %v1863_v49 = vld [vmem:[#allocation8 + $0x2] ss:$0 sm:$0xff] }
 0x477   : > { %v2398_v52 = vpop.eup %2397  ;;  %2415 = vrcp.f32 %v1138_v8  ;;  %2119 = vmatprep.subr.bf16.mxu0 %v1194_v61  ;;  %v1181_v31 = vmul.f32 %v2396_v25, %v3060_v5 }
 0x478   : > { %v2400_v56 = vpop.eup %2399  ;;  %v1184_v28 = vmul.f32 %v2398_v52, %v3064_v10 }
 0x479   : > { %v2402_v4 = vpop.eup %2401  ;;  %v1182_v32 = vmul.f32 %v2400_v56, %v3068_v34 }
 0x47a   : > { %v2404_v57 = vpop.eup %2403  ;;  %v1143_v62 = vadd.f32 1.0, %v2402_v4  ;;  %2120 = vmatpush3.bf16.msra.mxu0 %v1194_v61  ;;  %v1196_v35 = vpack.c.bf16 %v1184_v28, %v1183_v27 }
 0x47b   : > { %v2406_v59 = vpop.eup %2405  ;;  %v1141_v1 = vadd.f32 1.0, %v2404_v57  ;;  %v1195_v36 = vpack.c.bf16 %v1182_v32, %v1181_v31 }
 0x47c   : > { %v2408_v37 = vpop.eup %2407  ;;  %2417 = vrcp.f32 %v1143_v62  ;;  %v1144_v39 = vadd.f32 1.0, %v2406_v59 }
 0x47d   : > { %2419 = vrcp.f32 %v1141_v1  ;;  %v1142_v42 = vadd.f32 1.0, %v2408_v37  ;;  %2121 = vmatprep.subr.bf16.mxu0 %v1195_v36 }
 0x47e   : > { %v2410_v0 = vpop.eup %2409  ;;  %2421 = vrcp.f32 %v1144_v39  ;;  %2122 = vmatpush3.bf16.msra.mxu0 %v1195_v36 }
 0x47f   : > { %v2412_v10 = vpop.eup %2411  ;;  %2423 = vrcp.f32 %v1142_v42  ;;  %2123 = vmatprep.subr.bf16.mxu0 %v1196_v35  ;;  %v1187_v43 = vmul.f32 %v2410_v0, %v3073_v23 }
 0x480   : > { %v2414_v5 = vpop.eup %2413  ;;  %v1185_v46 = vmul.f32 %v2412_v10, %v3076_v26 }
 0x481   : > { %v2416_v34 = vpop.eup %2415  ;;  %v1188_v44 = vmul.f32 %v2414_v5, %v3080_v29 }
 0x482   : > { %v1186_v48 = vmul.f32 %v2416_v34, %v3084_v33  ;;  %2124 = vmatpush3.bf16.msra.mxu0 %v1196_v35 }
 0x483   : > { %v1198_v51 = vpack.c.bf16 %v1188_v44, %v1187_v43 }
 0x484   : > { %v1197_v11 = vpack.c.bf16 %v1186_v48, %v1185_v46 }
 0x486   : > { %v2418_v16 = vpop.eup %2417  ;;  %2125 = vmatprep.subr.bf16.mxu0 %v1197_v11 }
 0x487   : > { %v2420_v53 = vpop.eup %2419  ;;  %2126 = vmatpush3.bf16.msra.mxu0 %v1197_v11  ;;  %v1191_v2 = vmul.f32 %v2418_v16, %v3089_v40  ;;  %v2296_v40 = vld [vmem:[#allocation7 + $0xb8] sm:$0xff]  }
 0x488   : > { %v2422_v60 = vpop.eup %2421  ;;  %2127 = vmatprep.subr.bf16.mxu0 %v1198_v51  ;;  %v1189_v29 = vmul.f32 %v2420_v53, %v3092_v45  ;;  %2163 = vmatprep.subr.bf16.mxu1 %v2296_v40 }
 0x489   : > { %v2424_v63 = vpop.eup %2423  ;;  %v1192_v23 = vmul.f32 %v2422_v60, %v3096_v6  ;;  %2164 = vmatpush3.bf16.msra.mxu1 %v2296_v40 }
 0x48a   : > { %v1190_v26 = vmul.f32 %v2424_v63, %v3100_v58 }
 0x48b   : > { %2128 = vmatpush3.bf16.msra.mxu0 %v1198_v51  ;;  %v1200_v33 = vpack.c.bf16 %v1192_v23, %v1191_v2 }
 0x48c   : > { %v1199_v7 = vpack.c.bf16 %v1190_v26, %v1189_v29 }
 0x48e   : > { %2129 = vmatprep.subr.bf16.mxu0 %v1199_v7 }
 0x48f   : > { %2130 = vmatpush3.bf16.msra.mxu0 %v1199_v7 }
 0x490   : > { %2131 = vmatprep.subr.bf16.mxu0 %v1200_v33 }
 0x493   : > { %2132 = vmatpush3.bf16.msra.mxu0 %v1200_v33 }
 0x496   : > { %2134 = vmatmul.mubr.bf16.vlgmr.msra.gmra.mrb[32].mxu0 %v2920_v14 }
 0x497   : > { %2137 = vmatprep.mubr.bf16.mxu0 %v2923_v15 }
 0x49e   : > { %2138 = vmatmul.mubr.bf16.gmra.mrb[36].mxu0 %v2928_v18 }
 0x49f   : > { %2141 = vmatprep.mubr.bf16.mxu0 %v2931_v19 }
 0x4a6   : > { %2142 = vmatmul.mubr.bf16.gmra.mrb[40].mxu0 %v2936_v20 }
 0x4a7   : > { %2145 = vmatprep.mubr.bf16.mxu0 %v2939_v21 }
 0x4ae   : > { %2146 = vmatmul.mubr.bf16.gmra.mrb[44].mxu0 %v2944_v22 }
 0x569   : > { %v2135_v45 = vpop.f32.mrb[32].mxu0 }
 0x56a   : > { %v1254_v6 = vpop.f32.mrb[33].mxu0 }
 0x56b   : > { %v2136_v58 = vpop.f32.mrb[34].mxu0 }
 0x56c   : > { %v1318_v9 = vpack.c.bf16 %v2136_v58, %v2135_v45  ;;  %v1257_v14 = vpop.f32.mrb[35].mxu0 }
 0x56d   : > { %v1317_v30 = vpack.c.bf16 %v1257_v14, %v1254_v6 }
 0x56f   : > { %2165 = vmatprep.mubr.bf16.mxu1 %v1317_v30 }
 0x570   : > { %2166 = vmatmul.mubr.bf16.vlgmr.msra.gmra.mrb[32].mxu1 %v1318_v9 }
 0x571   : > { %v2139_v15 = vpop.f32.mrb[36].mxu0 }
 0x572   : > { %v1270_v18 = vpop.f32.mrb[37].mxu0 }
 0x573   : > { %v2140_v19 = vpop.f32.mrb[38].mxu0 }
 0x574   : > { %v1320_v38 = vpack.c.bf16 %v2140_v19, %v2139_v15  ;;  %v1273_v20 = vpop.f32.mrb[39].mxu0 }
 0x575   : > { %v1319_v41 = vpack.c.bf16 %v1273_v20, %v1270_v18 }
 0x577   : > { %2169 = vmatprep.mubr.bf16.mxu1 %v1319_v41 }
 0x578   : > { %2170 = vmatmul.mubr.bf16.gmra.mrb[36].mxu1 %v1320_v38 }
 0x579   : > { %v2143_v21 = vpop.f32.mrb[40].mxu0 }
 0x57a   : > { %v1286_v22 = vpop.f32.mrb[41].mxu0 }
 0x57b   : > { %v2144_v12 = vpop.f32.mrb[42].mxu0 }
 0x57c   : > { %v1322_v47 = vpack.c.bf16 %v2144_v12, %v2143_v21  ;;  %v1289_v50 = vpop.f32.mrb[43].mxu0 }
 0x57d   : > { %v1321_v54 = vpack.c.bf16 %v1289_v50, %v1286_v22 }
 0x57f   : > { %2173 = vmatprep.mubr.bf16.mxu1 %v1321_v54 }
 0x580   : > { %2174 = vmatmul.mubr.bf16.gmra.mrb[40].mxu1 %v1322_v47 }
 0x581   : > { %v2147_v61 = vpop.f32.mrb[44].mxu0 }
 0x582   : > { %v1302_v3 = vpop.f32.mrb[45].mxu0 }
 0x583   : > { %v2148_v13 = vpop.f32.mrb[46].mxu0 }
 0x584   : > { %v1324_v17 = vpack.c.bf16 %v2148_v13, %v2147_v61  ;;  %v1305_v24 = vpop.f32.mrb[47].mxu0 }
 0x585   : > { %v1323_v55 = vpack.c.bf16 %v1305_v24, %v1302_v3 }
 0x587   : > { %2177 = vmatprep.mubr.bf16.mxu1 %v1323_v55 }
 0x588   : > { %2178 = vmatmul.mubr.bf16.gmra.mrb[44].mxu1 %v1324_v17 }
 0x643   : > { %v2167_v8 = vpop.f32.mrb[32].mxu1 }
 0x644   : > { %v1422_v25 = vadd.f32 %v2167_v8, %v1863_v49  ;;  %v1413_v52 = vpop.f32.mrb[33].mxu1 }
 0x645   : > { %v1414_v56 = vadd.f32 %v1863_v49, %v1413_v52  ;;  %v2168_v27 = vpop.f32.mrb[34].mxu1 }
 0x646   : > { %v1874_v28 = vmul.f32 -1.442695, %v1422_v25  ;;  %v1425_v4 = vadd.f32 %v2168_v27, %v1863_v49  ;;  %v1416_v31 = vpop.f32.mrb[35].mxu1 }
 0x647   : > { %v1872_v32 = vmul.f32 -1.442695, %v1414_v56  ;;  %v1417_v57 = vadd.f32 %v1863_v49, %v1416_v31 }
 0x648   : > { %2425 = vpow2.f32 %v1874_v28  ;;  %v1875_v62 = vmul.f32 -1.442695, %v1425_v4 }
 0x649   : > { %2427 = vpow2.f32 %v1872_v32  ;;  %v1873_v35 = vmul.f32 -1.442695, %v1417_v57 }
 0x64a   : > { %2429 = vpow2.f32 %v1875_v62 }
 0x64b   : > { %2431 = vpow2.f32 %v1873_v35  ;;  %v2171_v59 = vpop.f32.mrb[36].mxu1 }
 0x64c   : > { %v1429_v1 = vpop.f32.mrb[37].mxu1 }
 0x64d   : > { %v2172_v36 = vpop.f32.mrb[38].mxu1 }
 0x64e   : > { %v1432_v37 = vpop.f32.mrb[39].mxu1 }
 0x652   : > { %v2426_v39 = vpop.eup %2425 }
 0x653   : > { %v2428_v42 = vpop.eup %2427  ;;  %v1526_v0 = vadd.f32 1.0, %v2426_v39  ;;  %v2175_v10 = vpop.f32.mrb[40].mxu1 }
 0x654   : > { %v2430_v5 = vpop.eup %2429  ;;  %v1524_v34 = vadd.f32 1.0, %v2428_v42  ;;  %v1445_v43 = vpop.f32.mrb[41].mxu1 }
 0x655   : > { %v2432_v44 = vpop.eup %2431  ;;  %v2176_v46 = vpop.f32.mrb[42].mxu1  ;;  %v1527_v48 = vadd.f32 1.0, %v2430_v5 }
 0x656   : > { %2433 = vrcp.f32 %v1524_v34  ;;  %v1525_v51 = vadd.f32 1.0, %v2432_v44  ;;  %v1448_v11 = vpop.f32.mrb[43].mxu1 }
 0x657   : > { %2435 = vrcp.f32 %v1526_v0 }
 0x658   : > { %2437 = vrcp.f32 %v1525_v51 }
 0x659   : > { %2439 = vrcp.f32 %v1527_v48 }
 0x65b   : > { %v2179_v16 = vpop.f32.mrb[44].mxu1 }
 0x65c   : > { %v1461_v53 = vpop.f32.mrb[45].mxu1 }
 0x65d   : > { %v2180_v60 = vpop.f32.mrb[46].mxu1 }
 0x65e   : > { %v1464_v63 = vpop.f32.mrb[47].mxu1 }
 0x660   : > { %v2434_v2 = vpop.eup %2433 }
 0x661   : > { %v2436_v23 = vpop.eup %2435  ;;  %v1572_v26 = vmul.f32 %v2434_v2, %v1414_v56 }
 0x662   : > { %v2438_v29 = vpop.eup %2437  ;;  %v1574_v40 = vmul.f32 %v2436_v23, %v1422_v25 }
 0x663   : > { %v1573_v33 = vmul.f32 %v2438_v29, %v1417_v57  ;;  %v2440_v7 = vpop.eup %2439 }
 0x664   : > { %v1575_v6 = vmul.f32 %v2440_v7, %v1425_v4 }
 0x665   : > { %v1637_v45 = vadd.f32 %v1573_v33, %v1572_v26 }
 0x667   : > { %v1638_v58 = vadd.f32 %v1637_v45, %v1574_v40 }
 0x669   : > { %v1639_v9 = vadd.f32 %v1638_v58, %v1575_v6 }
 0x66b   : > { %v1652_v14 = vrot.slane %v1639_v9, 4 }
 0x66d   : > { %v1653_v30 = vadd.f32 %v1652_v14, %v1639_v9 }
 0x66f   : > { %v1654_v15 = vrot.slane %v1653_v30, 2 }
 0x671   : > { %v1655_v18 = vadd.f32 %v1654_v15, %v1653_v30 }
 0x673   : > { %v1656_v19 = vrot.slane %v1655_v18, 1 }
 0x675   : > { %v1657_v38 = vadd.f32 %v1656_v19, %v1655_v18 }
 0x677   : > { %v1658_v20 = vmul.f32 0.03125, %v1657_v38 }
 0x679   : > { %1659 = vst [vmem:[%s283_s5] sm:$0x1] %v1658_v20 }
 0x67a   : > { %2570 = shalt.err (!%p2567_p11)
}
 0x67b   : > { %s2571_s0 = scalar_lea.hbm %s3132_s12, 16  ;;  %s2575_s26 = scalar_lea.hbm %s3179_s4, 128 }
 0x67c   : > { %p2572_p0 = scmp.ne.s32.totalorder %s3132_s12, %s2571_s0  ;;  %p2576_p13 = scmp.lt.u32.totalorder %s3132_s12, %s3179_s4 }
 0x67d   : > { %p2577_p3 = scmp.lt.u32.totalorder %s2575_s26, %s2571_s0  ;;  %p2579_p9 = scmp.lt.u32.totalorder %s2571_s0, %s3132_s12 }
 0x67e   : > { %p2573_p2 = pnand %p2572_p0, %p2790_p8 }
 0x67f   : > { %p2578_p7 = por %p2577_p3, %p2576_p13 }
 0x680   : > { %p2574_p10 = pneg %p2573_p2 }
 0x681   : > { %p2580_p12 = por %p2579_p9, %p2578_p7 }
 0x683   : > { %p2581_p5 = pnand %p2580_p12, %p2574_p10 }
 0x685   : > { %2584 = shalt.err (!%p2581_p5)
}
 0x686   : > { %2193 = dma.vmem_to_hbm [thread:$0]  (%p2790_p8), %s3134_s24, 16, %s3132_s12, %s1661_s30  }
 0x687 PF: > { %p2218_p1 = scmp.ge.s32.totalorder %s2635_s18, 2  ;;  %s1685_s23 = sand.u32 1, %s2623_s15  }
 0x688   : > { %p3204_p4 = scmp.ne.s32.totalorder %s3189_s22, 0  ;;  %s1686_s20 = scalar_lea.sflag [#allocation4], %s1685_s23 }
 0x68a   : > { %p2210_p6 = pnand %p2218_p1, %p3204_p4 }
 0x68c   : > { %2618 = dma.done.wait (!%p2210_p6), %s1686_s20, 16  }
 0x68d   : > { %2620 = vsyncadd (!%p2210_p6), %s1686_s20, 4294967280  ;;  %p21_p11 = scmp.ge.s32.totalorder %s2777_s14, 10   ;;  %s3205_s15 = smov %s2627_s16 }
 0x68e   : > { %s3206_s16 = smov %s2631_s17  ;;  %s3207_s17 = smov %s2786_s27 }
 0x68f   : > { %s3208_s18 = smov %s2777_s14  ;;  %23 = sbr.rel (!%p21_p11) target bundleno = 10 (0xa), region = 106 }
 0x696   :  { %1690 = vsyncpa [#allocation3], 1 }
 0x697   :  { %1692 = vsyncpa [#allocation3 + $0x1], 1 }
 0x698   :  { %1693 = vsyncpa [#allocation6], 1 }
 0x699   :  { %1695 = vsyncpa [#allocation6 + $0x1], 1 }
 0x69a   :  { %1696 = vsyncpa [#allocation9], 1 }
 0x69b   :  { %1697 = vsyncpa [#allocation4], 1 }
 0x69c   :  { %1699 = vsyncpa [#allocation4 + $0x1], 1 }

</bundles_post_ra>
